<compile_context>
chip_gen: v6e
topology: v6e:2x2x1
jax: 0.10.0
libtpu: 0.0.40
codegen_flags: <defaults>
</compile_context>

<pallas_src>
import jax
import jax.numpy as jnp
from jax.experimental import pallas as pl
from jax.experimental.pallas import tpu as pltpu


# ----------------------------- Pallas kernel -------------------------------

def lstm_fused_kernel(lens_ref, x_ref, wih_ref, whh_ref, b_ref, wfc_ref,
                      bfc_ref, out_ref, gx_ref):
    """Whole bidirectional-LSTM forward (+ fc head) in one kernel invocation.

    Shapes:
      lens_ref : (B, 1)    int32   per-batch valid lengths
      x_ref    : (T*B, E)  f32     embedded tokens, row t*B + b
      wih_ref  : (E, 8H)   f32     [W_ih_fwd | W_ih_bwd] on lanes
      whh_ref  : (2, H, 4H) f32    recurrent weights per direction
      b_ref    : (1, 8H)   f32     [bias_fwd | bias_bwd]
      wfc_ref  : (2, H, O) f32     fc weight split per direction
      bfc_ref  : (1, O)    f32
      out_ref  : (B, O)    f32     fc(concat(h_fwd, h_bwd))
      gx_ref   : (T*B, 8H) f32     VMEM scratch: precomputed input gates
    """
    B = lens_ref.shape[0]
    TB, _ = x_ref.shape
    T = TB // B
    H = whh_ref.shape[1]
    G = 4 * H

    # (1) Hoisted input projection: one big MXU matmul for *all* timesteps and
    #     *both* directions, bias folded in.  Done once, outside the recurrence.
    gx_ref[...] = (jnp.dot(x_ref[...], wih_ref[...],
                           preferred_element_type=jnp.float32) + b_ref[...])

    lens = lens_ref[...]                  # (B, 1) int32, loaded once
    w_hh_f = whh_ref[0]                   # (H, 4H) resident in vregs
    w_hh_b = whh_ref[1]

    def cell(gates, c_prev):
        i_g = jax.nn.sigmoid(gates[:, 0 * H:1 * H])
        f_g = jax.nn.sigmoid(gates[:, 1 * H:2 * H])
        g_g = jnp.tanh(gates[:, 2 * H:3 * H])
        o_g = jax.nn.sigmoid(gates[:, 3 * H:4 * H])
        c_new = f_g * c_prev + i_g * g_g
        h_new = o_g * jnp.tanh(c_new)
        return h_new, c_new

    # (2) Both directions fused into a single serial time loop.
    def step(t, carry):
        h_f, c_f, h_b, c_b = carry
        t_b = T - 1 - t

        # forward gates of step t, backward gates of step T-1-t (lane-aligned
        # 4H=G slabs of the precomputed (T*B, 8H) scratch).
        gx_f = gx_ref[pl.ds(t * B, B), 0:G]          # (B, 4H)
        gx_b = gx_ref[pl.ds(t_b * B, B), G:2 * G]    # (B, 4H)

        gates_f = gx_f + jnp.dot(h_f, w_hh_f, preferred_element_type=jnp.float32)
        gates_b = gx_b + jnp.dot(h_b, w_hh_b, preferred_element_type=jnp.float32)

        h_f_new, c_f_new = cell(gates_f, c_f)
        h_b_new, c_b_new = cell(gates_b, c_b)

        # packed-sequence semantics: only update while t within each sequence.
        m_f = lens > t                                # (B, 1)
        m_b = lens > t_b
        h_f = jnp.where(m_f, h_f_new, h_f)
        c_f = jnp.where(m_f, c_f_new, c_f)
        h_b = jnp.where(m_b, h_b_new, h_b)
        c_b = jnp.where(m_b, c_b_new, c_b)
        return h_f, c_f, h_b, c_b

    z = jnp.zeros((B, H), jnp.float32)
    h_f, c_f, h_b, c_b = jax.lax.fori_loop(0, T, step, (z, z, z, z),
                                           unroll=True)

    # (3) Fused fc head, weight split per direction so no lane concat needed:
    #     concat(h_f, h_b) @ W_fc == h_f @ W_fc[:H] + h_b @ W_fc[H:].
    out_ref[...] = (jnp.dot(h_f, wfc_ref[0], preferred_element_type=jnp.float32)
                    + jnp.dot(h_b, wfc_ref[1], preferred_element_type=jnp.float32)
                    + bfc_ref[...])


# ------------------------------- wrappers ----------------------------------

def lstm_head_pallas(embedded, lengths, w_ih, w_hh, bias, w_fc, b_fc):
    """embedded: (T, B, E) f32, lengths: (B,) i32 -> (B, O) logits."""
    T, B, E = embedded.shape
    H = w_hh.shape[1]
    O = w_fc.shape[1]

    x_flat = embedded.reshape(T * B, E)                         # lane-dense slab
    wih_cat = jnp.concatenate([w_ih[0], w_ih[1]], axis=-1)      # (E, 8H)
    b_cat = jnp.concatenate([bias[0], bias[1]], axis=-1)        # (1, 8H)
    wfc_split = w_fc.reshape(2, H, O)                           # fwd rows | bwd rows
    lens2d = lengths.astype(jnp.int32)[:, None]                 # (B, 1)

    vmem = pl.BlockSpec(memory_space=pltpu.MemorySpace.VMEM)
    return pl.pallas_call(
        lstm_fused_kernel,
        out_shape=jax.ShapeDtypeStruct((B, O), jnp.float32),
        in_specs=[vmem] * 7,
        out_specs=vmem,
        scratch_shapes=[pltpu.VMEM((T * B, 8 * H), jnp.float32)],
    )(lens2d, x_flat, wih_cat, w_hh, b_cat, wfc_split, b_fc)


@jax.jit
def lstm_model_forward(text, text_lengths, params):
    # embedding lookup (gather, left to XLA) + eval-mode dropout (identity)
    embedded = jnp.take(params["emb"], text, axis=0)            # (T, B, E)
    return lstm_head_pallas(embedded, text_lengths,
                            params["w_ih"], params["w_hh"], params["b"],
                            params["w_fc"], params["b_fc"])     # (B, O)


# ----------------------------- pure-JAX reference ---------------------------

def lstm_model_ref(text, text_lengths, params):
    emb = jnp.take(params["emb"], text, axis=0)
    T, B, E = emb.shape
    H = params["w_hh"].shape[1]
    lengths = text_lengths.astype(jnp.int32)

    def run_dir(d):
        def step(carry, t):
            h, c = carry
            step_t = jnp.where(d == 0, t, T - 1 - t)
            x_t = emb[step_t]
            gates = x_t @ params["w_ih"][d] + h @ params["w_hh"][d] + params["b"][d]
            i_, f_, g_, o_ = jnp.split(gates, 4, axis=1)
            i_ = jax.nn.sigmoid(i_); f_ = jax.nn.sigmoid(f_)
            g_ = jnp.tanh(g_); o_ = jax.nn.sigmoid(o_)
            c_new = f_ * c + i_ * g_
            h_new = o_ * jnp.tanh(c_new)
            m = (lengths > step_t)[:, None]
            return (jnp.where(m, h_new, h), jnp.where(m, c_new, c)), None

        init = (jnp.zeros((B, H), jnp.float32), jnp.zeros((B, H), jnp.float32))
        (h, _), _ = jax.lax.scan(step, init, jnp.arange(T))
        return h

    h_cat = jnp.concatenate([run_dir(0), run_dir(1)], axis=1)
    return h_cat @ params["w_fc"] + params["b_fc"]


# ---------------------------------- main ------------------------------------

if __name__ == "__main__":
    # small config implied by the module: vocab, embed, hidden, out, 1 layer, bidir
    V, E, H, O = 50, 32, 32, 4
    T, B = 8, 2

    key = jax.random.PRNGKey(0)
    ks = jax.random.split(key, 8)
    scale = 1.0 / jnp.sqrt(jnp.float32(H))

    params = {
        "emb": (jax.random.normal(ks[0], (V, E), jnp.float32) * 0.1),
        "w_ih": jax.random.uniform(ks[1], (2, E, 4 * H), jnp.float32, -scale, scale),
        "w_hh": jax.random.uniform(ks[2], (2, H, 4 * H), jnp.float32, -scale, scale),
        # combined b_ih + b_hh
        "b": jax.random.uniform(ks[3], (2, 1, 4 * H), jnp.float32, -scale, scale),
        "w_fc": jax.random.uniform(ks[4], (2 * H, O), jnp.float32, -scale, scale),
        "b_fc": jax.random.uniform(ks[5], (1, O), jnp.float32, -scale, scale),
    }

    text = jax.random.randint(ks[6], (T, B), 0, V, dtype=jnp.int32)
    text_lengths = jnp.array([8, 6], dtype=jnp.int32)  # sorted desc (packed seqs)

    out = lstm_model_forward(text, text_lengths, params)
    out = jax.block_until_ready(out)

    ref = lstm_model_ref(text, text_lengths, params)
    assert out.shape == (B, O)
    assert jnp.allclose(out, ref, atol=1e-4, rtol=1e-4), (out, ref)

    print("KERNEL_OK")
</pallas_src>

<mosaic_0001>
module attributes {stable_mosaic.version = 11 : i64} {
  func.func @lstm_fused_kernel(%arg0: memref<2x1xi32, #tpu.memory_space<vmem>>, %arg1: memref<16x32xf32, #tpu.memory_space<vmem>>, %arg2: memref<32x256xf32, #tpu.memory_space<vmem>>, %arg3: memref<2x32x128xf32, #tpu.memory_space<vmem>>, %arg4: memref<1x256xf32, #tpu.memory_space<vmem>>, %arg5: memref<2x32x4xf32, #tpu.memory_space<vmem>>, %arg6: memref<1x4xf32, #tpu.memory_space<vmem>>, %arg7: memref<2x4xf32, #tpu.memory_space<vmem>>, %arg8: memref<16x256xf32, #tpu.memory_space<vmem>>) attributes {dimension_semantics = [], scalar_prefetch = 0 : i64, scratch_operands = 1 : i64, tpu.core_type = #tpu.core_type<tc>} {
    %c0 = arith.constant 0 : index
    %c0_0 = arith.constant 0 : index
    %0 = vector.load %arg1[%c0, %c0_0] : memref<16x32xf32, #tpu.memory_space<vmem>>, vector<16x32xf32>
    %c0_1 = arith.constant 0 : index
    %c0_2 = arith.constant 0 : index
    %1 = vector.load %arg2[%c0_1, %c0_2] : memref<32x256xf32, #tpu.memory_space<vmem>>, vector<32x256xf32>
    %cst = arith.constant dense<0.000000e+00> : vector<16x256xf32>
    %2 = tpu.matmul %0, %1, %cst {dimension_numbers = #tpu.dot_dimension_numbers<[1], [0], [0], [1], [0, 0, 1, 1], [], []>} : vector<16x32xf32>, vector<32x256xf32>, vector<16x256xf32> -> vector<16x256xf32>
    %c0_3 = arith.constant 0 : index
    %c0_4 = arith.constant 0 : index
    %3 = vector.load %arg4[%c0_3, %c0_4] : memref<1x256xf32, #tpu.memory_space<vmem>>, vector<1x256xf32>
    %4 = vector.broadcast %3 : vector<1x256xf32> to vector<16x256xf32>
    %5 = arith.addf %2, %4 : vector<16x256xf32>
    %c0_5 = arith.constant 0 : index
    %c0_6 = arith.constant 0 : index
    %6 = vector.load %arg8[%c0_5, %c0_6] : memref<16x256xf32, #tpu.memory_space<vmem>>, vector<16x256xf32>
    tpu.vector_store %arg8[%c0_5, %c0_6], %5 {strides = array<i32>} : memref<16x256xf32, #tpu.memory_space<vmem>>, vector<16x256xf32>,
    %c0_7 = arith.constant 0 : index
    %c0_8 = arith.constant 0 : index
    %7 = vector.load %arg0[%c0_7, %c0_8] : memref<2x1xi32, #tpu.memory_space<vmem>>, vector<2x1xi32>
    %c0_9 = arith.constant 0 : index
    %c0_10 = arith.constant 0 : index
    %c0_11 = arith.constant 0 : index
    %8 = vector.load %arg3[%c0_9, %c0_10, %c0_11] : memref<2x32x128xf32, #tpu.memory_space<vmem>>, vector<1x32x128xf32>
    %9 = vector.shape_cast %8 : vector<1x32x128xf32> to vector<32x128xf32>
    %c1 = arith.constant 1 : index
    %c0_12 = arith.constant 0 : index
    %c0_13 = arith.constant 0 : index
    %10 = vector.load %arg3[%c1, %c0_12, %c0_13] : memref<2x32x128xf32, #tpu.memory_space<vmem>>, vector<1x32x128xf32>
    %11 = vector.shape_cast %10 : vector<1x32x128xf32> to vector<32x128xf32>
    %cst_14 = arith.constant 0.000000e+00 : f32
    %12 = vector.broadcast %cst_14 : f32 to vector<2x32xf32>
    %c0_i32 = arith.constant 0 : i32
    %c7_i32 = arith.constant 7 : i32
    %13 = arith.subi %c7_i32, %c0_i32 : i32
    %c2_i32 = arith.constant 2 : i32
    %14 = arith.muli %c0_i32, %c2_i32 : i32
    %15 = arith.index_cast %14 : i32 to index
    %c0_15 = arith.constant 0 : index
    %16 = vector.load %arg8[%15, %c0_15] : memref<16x256xf32, #tpu.memory_space<vmem>>, vector<2x128xf32>
    %c2_i32_16 = arith.constant 2 : i32
    %17 = arith.muli %13, %c2_i32_16 : i32
    %18 = arith.index_cast %17 : i32 to index
    %c128 = arith.constant 128 : index
    %19 = vector.load %arg8[%18, %c128] : memref<16x256xf32, #tpu.memory_space<vmem>>, vector<2x128xf32>
    %cst_17 = arith.constant dense<0.000000e+00> : vector<2x128xf32>
    %20 = tpu.matmul %12, %9, %cst_17 {dimension_numbers = #tpu.dot_dimension_numbers<[1], [0], [0], [1], [0, 0, 1, 1], [], []>} : vector<2x32xf32>, vector<32x128xf32>, vector<2x128xf32> -> vector<2x128xf32>
    %21 = arith.addf %16, %20 : vector<2x128xf32>
    %cst_18 = arith.constant dense<0.000000e+00> : vector<2x128xf32>
    %22 = tpu.matmul %12, %11, %cst_18 {dimension_numbers = #tpu.dot_dimension_numbers<[1], [0], [0], [1], [0, 0, 1, 1], [], []>} : vector<2x32xf32>, vector<32x128xf32>, vector<2x128xf32> -> vector<2x128xf32>
    %23 = arith.addf %19, %22 : vector<2x128xf32>
    %24 = vector.extract_strided_slice %21 {offsets = [0, 0], sizes = [2, 32], strides = [1, 1]} : vector<2x128xf32> to vector<2x32xf32>
    %25 = arith.negf %24 : vector<2x32xf32>
    %26 = math.exp %25 : vector<2x32xf32>
    %cst_19 = arith.constant 1.000000e+00 : f32
    %27 = vector.broadcast %cst_19 : f32 to vector<2x32xf32>
    %28 = arith.addf %27, %26 : vector<2x32xf32>
    %29 = arith.divf %27, %28 : vector<2x32xf32>
    %30 = vector.extract_strided_slice %21 {offsets = [0, 32], sizes = [2, 32], strides = [1, 1]} : vector<2x128xf32> to vector<2x32xf32>
    %31 = arith.negf %30 : vector<2x32xf32>
    %32 = math.exp %31 : vector<2x32xf32>
    %cst_20 = arith.constant 1.000000e+00 : f32
    %33 = vector.broadcast %cst_20 : f32 to vector<2x32xf32>
    %34 = arith.addf %33, %32 : vector<2x32xf32>
    %35 = arith.divf %33, %34 : vector<2x32xf32>
    %36 = vector.extract_strided_slice %21 {offsets = [0, 64], sizes = [2, 32], strides = [1, 1]} : vector<2x128xf32> to vector<2x32xf32>
    %37 = math.tanh %36 : vector<2x32xf32>
    %38 = vector.extract_strided_slice %21 {offsets = [0, 96], sizes = [2, 32], strides = [1, 1]} : vector<2x128xf32> to vector<2x32xf32>
    %39 = arith.negf %38 : vector<2x32xf32>
    %40 = math.exp %39 : vector<2x32xf32>
    %cst_21 = arith.constant 1.000000e+00 : f32
    %41 = vector.broadcast %cst_21 : f32 to vector<2x32xf32>
    %42 = arith.addf %41, %40 : vector<2x32xf32>
    %43 = arith.divf %41, %42 : vector<2x32xf32>
    %44 = arith.mulf %35, %12 : vector<2x32xf32>
    %45 = arith.mulf %29, %37 : vector<2x32xf32>
    %46 = arith.addf %44, %45 : vector<2x32xf32>
    %47 = math.tanh %46 : vector<2x32xf32>
    %48 = arith.mulf %43, %47 : vector<2x32xf32>
    %49 = vector.extract_strided_slice %23 {offsets = [0, 0], sizes = [2, 32], strides = [1, 1]} : vector<2x128xf32> to vector<2x32xf32>
    %50 = arith.negf %49 : vector<2x32xf32>
    %51 = math.exp %50 : vector<2x32xf32>
    %cst_22 = arith.constant 1.000000e+00 : f32
    %52 = vector.broadcast %cst_22 : f32 to vector<2x32xf32>
    %53 = arith.addf %52, %51 : vector<2x32xf32>
    %54 = arith.divf %52, %53 : vector<2x32xf32>
    %55 = vector.extract_strided_slice %23 {offsets = [0, 32], sizes = [2, 32], strides = [1, 1]} : vector<2x128xf32> to vector<2x32xf32>
    %56 = arith.negf %55 : vector<2x32xf32>
    %57 = math.exp %56 : vector<2x32xf32>
    %cst_23 = arith.constant 1.000000e+00 : f32
    %58 = vector.broadcast %cst_23 : f32 to vector<2x32xf32>
    %59 = arith.addf %58, %57 : vector<2x32xf32>
    %60 = arith.divf %58, %59 : vector<2x32xf32>
    %61 = vector.extract_strided_slice %23 {offsets = [0, 64], sizes = [2, 32], strides = [1, 1]} : vector<2x128xf32> to vector<2x32xf32>
    %62 = math.tanh %61 : vector<2x32xf32>
    %63 = vector.extract_strided_slice %23 {offsets = [0, 96], sizes = [2, 32], strides = [1, 1]} : vector<2x128xf32> to vector<2x32xf32>
    %64 = arith.negf %63 : vector<2x32xf32>
    %65 = math.exp %64 : vector<2x32xf32>
    %cst_24 = arith.constant 1.000000e+00 : f32
    %66 = vector.broadcast %cst_24 : f32 to vector<2x32xf32>
    %67 = arith.addf %66, %65 : vector<2x32xf32>
    %68 = arith.divf %66, %67 : vector<2x32xf32>
    %69 = arith.mulf %60, %12 : vector<2x32xf32>
    %70 = arith.mulf %54, %62 : vector<2x32xf32>
    %71 = arith.addf %69, %70 : vector<2x32xf32>
    %72 = math.tanh %71 : vector<2x32xf32>
    %73 = arith.mulf %68, %72 : vector<2x32xf32>
    %74 = vector.broadcast %c0_i32 : i32 to vector<2x1xi32>
    %75 = arith.cmpi sgt, %7, %74 : vector<2x1xi32>
    %76 = vector.broadcast %13 : i32 to vector<2x1xi32>
    %77 = arith.cmpi sgt, %7, %76 : vector<2x1xi32>
    %78 = vector.shape_cast %75 : vector<2x1xi1> to vector<2x1xi1>
    %79 = vector.broadcast %78 : vector<2x1xi1> to vector<2x32xi1>
    %80 = arith.select %79, %48, %12 : vector<2x32xi1>, vector<2x32xf32>
    %81 = vector.shape_cast %75 : vector<2x1xi1> to vector<2x1xi1>
    %82 = vector.broadcast %81 : vector<2x1xi1> to vector<2x32xi1>
    %83 = arith.select %82, %46, %12 : vector<2x32xi1>, vector<2x32xf32>
    %84 = vector.shape_cast %77 : vector<2x1xi1> to vector<2x1xi1>
    %85 = vector.broadcast %84 : vector<2x1xi1> to vector<2x32xi1>
    %86 = arith.select %85, %73, %12 : vector<2x32xi1>, vector<2x32xf32>
    %87 = vector.shape_cast %77 : vector<2x1xi1> to vector<2x1xi1>
    %88 = vector.broadcast %87 : vector<2x1xi1> to vector<2x32xi1>
    %89 = arith.select %88, %71, %12 : vector<2x32xi1>, vector<2x32xf32>
    %c1_i32 = arith.constant 1 : i32
    %c7_i32_25 = arith.constant 7 : i32
    %90 = arith.subi %c7_i32_25, %c1_i32 : i32
    %c2_i32_26 = arith.constant 2 : i32
    %91 = arith.muli %c1_i32, %c2_i32_26 : i32
    %92 = arith.index_cast %91 : i32 to index
    %c0_27 = arith.constant 0 : index
    %93 = vector.load %arg8[%92, %c0_27] : memref<16x256xf32, #tpu.memory_space<vmem>>, vector<2x128xf32>
    %c2_i32_28 = arith.constant 2 : i32
    %94 = arith.muli %90, %c2_i32_28 : i32
    %95 = arith.index_cast %94 : i32 to index
    %c128_29 = arith.constant 128 : index
    %96 = vector.load %arg8[%95, %c128_29] : memref<16x256xf32, #tpu.memory_space<vmem>>, vector<2x128xf32>
    %cst_30 = arith.constant dense<0.000000e+00> : vector<2x128xf32>
    %97 = tpu.matmul %80, %9, %cst_30 {dimension_numbers = #tpu.dot_dimension_numbers<[1], [0], [0], [1], [0, 0, 1, 1], [], []>} : vector<2x32xf32>, vector<32x128xf32>, vector<2x128xf32> -> vector<2x128xf32>
    %98 = arith.addf %93, %97 : vector<2x128xf32>
    %cst_31 = arith.constant dense<0.000000e+00> : vector<2x128xf32>
    %99 = tpu.matmul %86, %11, %cst_31 {dimension_numbers = #tpu.dot_dimension_numbers<[1], [0], [0], [1], [0, 0, 1, 1], [], []>} : vector<2x32xf32>, vector<32x128xf32>, vector<2x128xf32> -> vector<2x128xf32>
    %100 = arith.addf %96, %99 : vector<2x128xf32>
    %101 = vector.extract_strided_slice %98 {offsets = [0, 0], sizes = [2, 32], strides = [1, 1]} : vector<2x128xf32> to vector<2x32xf32>
    %102 = arith.negf %101 : vector<2x32xf32>
    %103 = math.exp %102 : vector<2x32xf32>
    %cst_32 = arith.constant 1.000000e+00 : f32
    %104 = vector.broadcast %cst_32 : f32 to vector<2x32xf32>
    %105 = arith.addf %104, %103 : vector<2x32xf32>
    %106 = arith.divf %104, %105 : vector<2x32xf32>
    %107 = vector.extract_strided_slice %98 {offsets = [0, 32], sizes = [2, 32], strides = [1, 1]} : vector<2x128xf32> to vector<2x32xf32>
    %108 = arith.negf %107 : vector<2x32xf32>
    %109 = math.exp %108 : vector<2x32xf32>
    %cst_33 = arith.constant 1.000000e+00 : f32
    %110 = vector.broadcast %cst_33 : f32 to vector<2x32xf32>
    %111 = arith.addf %110, %109 : vector<2x32xf32>
    %112 = arith.divf %110, %111 : vector<2x32xf32>
    %113 = vector.extract_strided_slice %98 {offsets = [0, 64], sizes = [2, 32], strides = [1, 1]} : vector<2x128xf32> to vector<2x32xf32>
    %114 = math.tanh %113 : vector<2x32xf32>
    %115 = vector.extract_strided_slice %98 {offsets = [0, 96], sizes = [2, 32], strides = [1, 1]} : vector<2x128xf32> to vector<2x32xf32>
    %116 = arith.negf %115 : vector<2x32xf32>
    %117 = math.exp %116 : vector<2x32xf32>
    %cst_34 = arith.constant 1.000000e+00 : f32
    %118 = vector.broadcast %cst_34 : f32 to vector<2x32xf32>
    %119 = arith.addf %118, %117 : vector<2x32xf32>
    %120 = arith.divf %118, %119 : vector<2x32xf32>
    %121 = arith.mulf %112, %83 : vector<2x32xf32>
    %122 = arith.mulf %106, %114 : vector<2x32xf32>
    %123 = arith.addf %121, %122 : vector<2x32xf32>
    %124 = math.tanh %123 : vector<2x32xf32>
    %125 = arith.mulf %120, %124 : vector<2x32xf32>
    %126 = vector.extract_strided_slice %100 {offsets = [0, 0], sizes = [2, 32], strides = [1, 1]} : vector<2x128xf32> to vector<2x32xf32>
    %127 = arith.negf %126 : vector<2x32xf32>
    %128 = math.exp %127 : vector<2x32xf32>
    %cst_35 = arith.constant 1.000000e+00 : f32
    %129 = vector.broadcast %cst_35 : f32 to vector<2x32xf32>
    %130 = arith.addf %129, %128 : vector<2x32xf32>
    %131 = arith.divf %129, %130 : vector<2x32xf32>
    %132 = vector.extract_strided_slice %100 {offsets = [0, 32], sizes = [2, 32], strides = [1, 1]} : vector<2x128xf32> to vector<2x32xf32>
    %133 = arith.negf %132 : vector<2x32xf32>
    %134 = math.exp %133 : vector<2x32xf32>
    %cst_36 = arith.constant 1.000000e+00 : f32
    %135 = vector.broadcast %cst_36 : f32 to vector<2x32xf32>
    %136 = arith.addf %135, %134 : vector<2x32xf32>
    %137 = arith.divf %135, %136 : vector<2x32xf32>
    %138 = vector.extract_strided_slice %100 {offsets = [0, 64], sizes = [2, 32], strides = [1, 1]} : vector<2x128xf32> to vector<2x32xf32>
    %139 = math.tanh %138 : vector<2x32xf32>
    %140 = vector.extract_strided_slice %100 {offsets = [0, 96], sizes = [2, 32], strides = [1, 1]} : vector<2x128xf32> to vector<2x32xf32>
    %141 = arith.negf %140 : vector<2x32xf32>
    %142 = math.exp %141 : vector<2x32xf32>
    %cst_37 = arith.constant 1.000000e+00 : f32
    %143 = vector.broadcast %cst_37 : f32 to vector<2x32xf32>
    %144 = arith.addf %143, %142 : vector<2x32xf32>
    %145 = arith.divf %143, %144 : vector<2x32xf32>
    %146 = arith.mulf %137, %89 : vector<2x32xf32>
    %147 = arith.mulf %131, %139 : vector<2x32xf32>
    %148 = arith.addf %146, %147 : vector<2x32xf32>
    %149 = math.tanh %148 : vector<2x32xf32>
    %150 = arith.mulf %145, %149 : vector<2x32xf32>
    %151 = vector.broadcast %c1_i32 : i32 to vector<2x1xi32>
    %152 = arith.cmpi sgt, %7, %151 : vector<2x1xi32>
    %153 = vector.broadcast %90 : i32 to vector<2x1xi32>
    %154 = arith.cmpi sgt, %7, %153 : vector<2x1xi32>
    %155 = vector.shape_cast %152 : vector<2x1xi1> to vector<2x1xi1>
    %156 = vector.broadcast %155 : vector<2x1xi1> to vector<2x32xi1>
    %157 = arith.select %156, %125, %80 : vector<2x32xi1>, vector<2x32xf32>
    %158 = vector.shape_cast %152 : vector<2x1xi1> to vector<2x1xi1>
    %159 = vector.broadcast %158 : vector<2x1xi1> to vector<2x32xi1>
    %160 = arith.select %159, %123, %83 : vector<2x32xi1>, vector<2x32xf32>
    %161 = vector.shape_cast %154 : vector<2x1xi1> to vector<2x1xi1>
    %162 = vector.broadcast %161 : vector<2x1xi1> to vector<2x32xi1>
    %163 = arith.select %162, %150, %86 : vector<2x32xi1>, vector<2x32xf32>
    %164 = vector.shape_cast %154 : vector<2x1xi1> to vector<2x1xi1>
    %165 = vector.broadcast %164 : vector<2x1xi1> to vector<2x32xi1>
    %166 = arith.select %165, %148, %89 : vector<2x32xi1>, vector<2x32xf32>
    %c2_i32_38 = arith.constant 2 : i32
    %c7_i32_39 = arith.constant 7 : i32
    %167 = arith.subi %c7_i32_39, %c2_i32_38 : i32
    %c2_i32_40 = arith.constant 2 : i32
    %168 = arith.muli %c2_i32_38, %c2_i32_40 : i32
    %169 = arith.index_cast %168 : i32 to index
    %c0_41 = arith.constant 0 : index
    %170 = vector.load %arg8[%169, %c0_41] : memref<16x256xf32, #tpu.memory_space<vmem>>, vector<2x128xf32>
    %c2_i32_42 = arith.constant 2 : i32
    %171 = arith.muli %167, %c2_i32_42 : i32
    %172 = arith.index_cast %171 : i32 to index
    %c128_43 = arith.constant 128 : index
    %173 = vector.load %arg8[%172, %c128_43] : memref<16x256xf32, #tpu.memory_space<vmem>>, vector<2x128xf32>
    %cst_44 = arith.constant dense<0.000000e+00> : vector<2x128xf32>
    %174 = tpu.matmul %157, %9, %cst_44 {dimension_numbers = #tpu.dot_dimension_numbers<[1], [0], [0], [1], [0, 0, 1, 1], [], []>} : vector<2x32xf32>, vector<32x128xf32>, vector<2x128xf32> -> vector<2x128xf32>
    %175 = arith.addf %170, %174 : vector<2x128xf32>
    %cst_45 = arith.constant dense<0.000000e+00> : vector<2x128xf32>
    %176 = tpu.matmul %163, %11, %cst_45 {dimension_numbers = #tpu.dot_dimension_numbers<[1], [0], [0], [1], [0, 0, 1, 1], [], []>} : vector<2x32xf32>, vector<32x128xf32>, vector<2x128xf32> -> vector<2x128xf32>
    %177 = arith.addf %173, %176 : vector<2x128xf32>
    %178 = vector.extract_strided_slice %175 {offsets = [0, 0], sizes = [2, 32], strides = [1, 1]} : vector<2x128xf32> to vector<2x32xf32>
    %179 = arith.negf %178 : vector<2x32xf32>
    %180 = math.exp %179 : vector<2x32xf32>
    %cst_46 = arith.constant 1.000000e+00 : f32
    %181 = vector.broadcast %cst_46 : f32 to vector<2x32xf32>
    %182 = arith.addf %181, %180 : vector<2x32xf32>
    %183 = arith.divf %181, %182 : vector<2x32xf32>
    %184 = vector.extract_strided_slice %175 {offsets = [0, 32], sizes = [2, 32], strides = [1, 1]} : vector<2x128xf32> to vector<2x32xf32>
    %185 = arith.negf %184 : vector<2x32xf32>
    %186 = math.exp %185 : vector<2x32xf32>
    %cst_47 = arith.constant 1.000000e+00 : f32
    %187 = vector.broadcast %cst_47 : f32 to vector<2x32xf32>
    %188 = arith.addf %187, %186 : vector<2x32xf32>
    %189 = arith.divf %187, %188 : vector<2x32xf32>
    %190 = vector.extract_strided_slice %175 {offsets = [0, 64], sizes = [2, 32], strides = [1, 1]} : vector<2x128xf32> to vector<2x32xf32>
    %191 = math.tanh %190 : vector<2x32xf32>
    %192 = vector.extract_strided_slice %175 {offsets = [0, 96], sizes = [2, 32], strides = [1, 1]} : vector<2x128xf32> to vector<2x32xf32>
    %193 = arith.negf %192 : vector<2x32xf32>
    %194 = math.exp %193 : vector<2x32xf32>
    %cst_48 = arith.constant 1.000000e+00 : f32
    %195 = vector.broadcast %cst_48 : f32 to vector<2x32xf32>
    %196 = arith.addf %195, %194 : vector<2x32xf32>
    %197 = arith.divf %195, %196 : vector<2x32xf32>
    %198 = arith.mulf %189, %160 : vector<2x32xf32>
    %199 = arith.mulf %183, %191 : vector<2x32xf32>
    %200 = arith.addf %198, %199 : vector<2x32xf32>
    %201 = math.tanh %200 : vector<2x32xf32>
    %202 = arith.mulf %197, %201 : vector<2x32xf32>
    %203 = vector.extract_strided_slice %177 {offsets = [0, 0], sizes = [2, 32], strides = [1, 1]} : vector<2x128xf32> to vector<2x32xf32>
    %204 = arith.negf %203 : vector<2x32xf32>
    %205 = math.exp %204 : vector<2x32xf32>
    %cst_49 = arith.constant 1.000000e+00 : f32
    %206 = vector.broadcast %cst_49 : f32 to vector<2x32xf32>
    %207 = arith.addf %206, %205 : vector<2x32xf32>
    %208 = arith.divf %206, %207 : vector<2x32xf32>
    %209 = vector.extract_strided_slice %177 {offsets = [0, 32], sizes = [2, 32], strides = [1, 1]} : vector<2x128xf32> to vector<2x32xf32>
    %210 = arith.negf %209 : vector<2x32xf32>
    %211 = math.exp %210 : vector<2x32xf32>
    %cst_50 = arith.constant 1.000000e+00 : f32
    %212 = vector.broadcast %cst_50 : f32 to vector<2x32xf32>
    %213 = arith.addf %212, %211 : vector<2x32xf32>
    %214 = arith.divf %212, %213 : vector<2x32xf32>
    %215 = vector.extract_strided_slice %177 {offsets = [0, 64], sizes = [2, 32], strides = [1, 1]} : vector<2x128xf32> to vector<2x32xf32>
    %216 = math.tanh %215 : vector<2x32xf32>
    %217 = vector.extract_strided_slice %177 {offsets = [0, 96], sizes = [2, 32], strides = [1, 1]} : vector<2x128xf32> to vector<2x32xf32>
    %218 = arith.negf %217 : vector<2x32xf32>
    %219 = math.exp %218 : vector<2x32xf32>
    %cst_51 = arith.constant 1.000000e+00 : f32
    %220 = vector.broadcast %cst_51 : f32 to vector<2x32xf32>
    %221 = arith.addf %220, %219 : vector<2x32xf32>
    %222 = arith.divf %220, %221 : vector<2x32xf32>
    %223 = arith.mulf %214, %166 : vector<2x32xf32>
    %224 = arith.mulf %208, %216 : vector<2x32xf32>
    %225 = arith.addf %223, %224 : vector<2x32xf32>
    %226 = math.tanh %225 : vector<2x32xf32>
    %227 = arith.mulf %222, %226 : vector<2x32xf32>
    %228 = vector.broadcast %c2_i32_38 : i32 to vector<2x1xi32>
    %229 = arith.cmpi sgt, %7, %228 : vector<2x1xi32>
    %230 = vector.broadcast %167 : i32 to vector<2x1xi32>
    %231 = arith.cmpi sgt, %7, %230 : vector<2x1xi32>
    %232 = vector.shape_cast %229 : vector<2x1xi1> to vector<2x1xi1>
    %233 = vector.broadcast %232 : vector<2x1xi1> to vector<2x32xi1>
    %234 = arith.select %233, %202, %157 : vector<2x32xi1>, vector<2x32xf32>
    %235 = vector.shape_cast %229 : vector<2x1xi1> to vector<2x1xi1>
    %236 = vector.broadcast %235 : vector<2x1xi1> to vector<2x32xi1>
    %237 = arith.select %236, %200, %160 : vector<2x32xi1>, vector<2x32xf32>
    %238 = vector.shape_cast %231 : vector<2x1xi1> to vector<2x1xi1>
    %239 = vector.broadcast %238 : vector<2x1xi1> to vector<2x32xi1>
    %240 = arith.select %239, %227, %163 : vector<2x32xi1>, vector<2x32xf32>
    %241 = vector.shape_cast %231 : vector<2x1xi1> to vector<2x1xi1>
    %242 = vector.broadcast %241 : vector<2x1xi1> to vector<2x32xi1>
    %243 = arith.select %242, %225, %166 : vector<2x32xi1>, vector<2x32xf32>
    %c3_i32 = arith.constant 3 : i32
    %c7_i32_52 = arith.constant 7 : i32
    %244 = arith.subi %c7_i32_52, %c3_i32 : i32
    %c2_i32_53 = arith.constant 2 : i32
    %245 = arith.muli %c3_i32, %c2_i32_53 : i32
    %246 = arith.index_cast %245 : i32 to index
    %c0_54 = arith.constant 0 : index
    %247 = vector.load %arg8[%246, %c0_54] : memref<16x256xf32, #tpu.memory_space<vmem>>, vector<2x128xf32>
    %c2_i32_55 = arith.constant 2 : i32
    %248 = arith.muli %244, %c2_i32_55 : i32
    %249 = arith.index_cast %248 : i32 to index
    %c128_56 = arith.constant 128 : index
    %250 = vector.load %arg8[%249, %c128_56] : memref<16x256xf32, #tpu.memory_space<vmem>>, vector<2x128xf32>
    %cst_57 = arith.constant dense<0.000000e+00> : vector<2x128xf32>
    %251 = tpu.matmul %234, %9, %cst_57 {dimension_numbers = #tpu.dot_dimension_numbers<[1], [0], [0], [1], [0, 0, 1, 1], [], []>} : vector<2x32xf32>, vector<32x128xf32>, vector<2x128xf32> -> vector<2x128xf32>
    %252 = arith.addf %247, %251 : vector<2x128xf32>
    %cst_58 = arith.constant dense<0.000000e+00> : vector<2x128xf32>
    %253 = tpu.matmul %240, %11, %cst_58 {dimension_numbers = #tpu.dot_dimension_numbers<[1], [0], [0], [1], [0, 0, 1, 1], [], []>} : vector<2x32xf32>, vector<32x128xf32>, vector<2x128xf32> -> vector<2x128xf32>
    %254 = arith.addf %250, %253 : vector<2x128xf32>
    %255 = vector.extract_strided_slice %252 {offsets = [0, 0], sizes = [2, 32], strides = [1, 1]} : vector<2x128xf32> to vector<2x32xf32>
    %256 = arith.negf %255 : vector<2x32xf32>
    %257 = math.exp %256 : vector<2x32xf32>
    %cst_59 = arith.constant 1.000000e+00 : f32
    %258 = vector.broadcast %cst_59 : f32 to vector<2x32xf32>
    %259 = arith.addf %258, %257 : vector<2x32xf32>
    %260 = arith.divf %258, %259 : vector<2x32xf32>
    %261 = vector.extract_strided_slice %252 {offsets = [0, 32], sizes = [2, 32], strides = [1, 1]} : vector<2x128xf32> to vector<2x32xf32>
    %262 = arith.negf %261 : vector<2x32xf32>
    %263 = math.exp %262 : vector<2x32xf32>
    %cst_60 = arith.constant 1.000000e+00 : f32
    %264 = vector.broadcast %cst_60 : f32 to vector<2x32xf32>
    %265 = arith.addf %264, %263 : vector<2x32xf32>
    %266 = arith.divf %264, %265 : vector<2x32xf32>
    %267 = vector.extract_strided_slice %252 {offsets = [0, 64], sizes = [2, 32], strides = [1, 1]} : vector<2x128xf32> to vector<2x32xf32>
    %268 = math.tanh %267 : vector<2x32xf32>
    %269 = vector.extract_strided_slice %252 {offsets = [0, 96], sizes = [2, 32], strides = [1, 1]} : vector<2x128xf32> to vector<2x32xf32>
    %270 = arith.negf %269 : vector<2x32xf32>
    %271 = math.exp %270 : vector<2x32xf32>
    %cst_61 = arith.constant 1.000000e+00 : f32
    %272 = vector.broadcast %cst_61 : f32 to vector<2x32xf32>
    %273 = arith.addf %272, %271 : vector<2x32xf32>
    %274 = arith.divf %272, %273 : vector<2x32xf32>
    %275 = arith.mulf %266, %237 : vector<2x32xf32>
    %276 = arith.mulf %260, %268 : vector<2x32xf32>
    %277 = arith.addf %275, %276 : vector<2x32xf32>
    %278 = math.tanh %277 : vector<2x32xf32>
    %279 = arith.mulf %274, %278 : vector<2x32xf32>
    %280 = vector.extract_strided_slice %254 {offsets = [0, 0], sizes = [2, 32], strides = [1, 1]} : vector<2x128xf32> to vector<2x32xf32>
    %281 = arith.negf %280 : vector<2x32xf32>
    %282 = math.exp %281 : vector<2x32xf32>
    %cst_62 = arith.constant 1.000000e+00 : f32
    %283 = vector.broadcast %cst_62 : f32 to vector<2x32xf32>
    %284 = arith.addf %283, %282 : vector<2x32xf32>
    %285 = arith.divf %283, %284 : vector<2x32xf32>
    %286 = vector.extract_strided_slice %254 {offsets = [0, 32], sizes = [2, 32], strides = [1, 1]} : vector<2x128xf32> to vector<2x32xf32>
    %287 = arith.negf %286 : vector<2x32xf32>
    %288 = math.exp %287 : vector<2x32xf32>
    %cst_63 = arith.constant 1.000000e+00 : f32
    %289 = vector.broadcast %cst_63 : f32 to vector<2x32xf32>
    %290 = arith.addf %289, %288 : vector<2x32xf32>
    %291 = arith.divf %289, %290 : vector<2x32xf32>
    %292 = vector.extract_strided_slice %254 {offsets = [0, 64], sizes = [2, 32], strides = [1, 1]} : vector<2x128xf32> to vector<2x32xf32>
    %293 = math.tanh %292 : vector<2x32xf32>
    %294 = vector.extract_strided_slice %254 {offsets = [0, 96], sizes = [2, 32], strides = [1, 1]} : vector<2x128xf32> to vector<2x32xf32>
    %295 = arith.negf %294 : vector<2x32xf32>
    %296 = math.exp %295 : vector<2x32xf32>
    %cst_64 = arith.constant 1.000000e+00 : f32
    %297 = vector.broadcast %cst_64 : f32 to vector<2x32xf32>
    %298 = arith.addf %297, %296 : vector<2x32xf32>
    %299 = arith.divf %297, %298 : vector<2x32xf32>
    %300 = arith.mulf %291, %243 : vector<2x32xf32>
    %301 = arith.mulf %285, %293 : vector<2x32xf32>
    %302 = arith.addf %300, %301 : vector<2x32xf32>
    %303 = math.tanh %302 : vector<2x32xf32>
    %304 = arith.mulf %299, %303 : vector<2x32xf32>
    %305 = vector.broadcast %c3_i32 : i32 to vector<2x1xi32>
    %306 = arith.cmpi sgt, %7, %305 : vector<2x1xi32>
    %307 = vector.broadcast %244 : i32 to vector<2x1xi32>
    %308 = arith.cmpi sgt, %7, %307 : vector<2x1xi32>
    %309 = vector.shape_cast %306 : vector<2x1xi1> to vector<2x1xi1>
    %310 = vector.broadcast %309 : vector<2x1xi1> to vector<2x32xi1>
    %311 = arith.select %310, %279, %234 : vector<2x32xi1>, vector<2x32xf32>
    %312 = vector.shape_cast %306 : vector<2x1xi1> to vector<2x1xi1>
    %313 = vector.broadcast %312 : vector<2x1xi1> to vector<2x32xi1>
    %314 = arith.select %313, %277, %237 : vector<2x32xi1>, vector<2x32xf32>
    %315 = vector.shape_cast %308 : vector<2x1xi1> to vector<2x1xi1>
    %316 = vector.broadcast %315 : vector<2x1xi1> to vector<2x32xi1>
    %317 = arith.select %316, %304, %240 : vector<2x32xi1>, vector<2x32xf32>
    %318 = vector.shape_cast %308 : vector<2x1xi1> to vector<2x1xi1>
    %319 = vector.broadcast %318 : vector<2x1xi1> to vector<2x32xi1>
    %320 = arith.select %319, %302, %243 : vector<2x32xi1>, vector<2x32xf32>
    %c4_i32 = arith.constant 4 : i32
    %c7_i32_65 = arith.constant 7 : i32
    %321 = arith.subi %c7_i32_65, %c4_i32 : i32
    %c2_i32_66 = arith.constant 2 : i32
    %322 = arith.muli %c4_i32, %c2_i32_66 : i32
    %323 = arith.index_cast %322 : i32 to index
    %c0_67 = arith.constant 0 : index
    %324 = vector.load %arg8[%323, %c0_67] : memref<16x256xf32, #tpu.memory_space<vmem>>, vector<2x128xf32>
    %c2_i32_68 = arith.constant 2 : i32
    %325 = arith.muli %321, %c2_i32_68 : i32
    %326 = arith.index_cast %325 : i32 to index
    %c128_69 = arith.constant 128 : index
    %327 = vector.load %arg8[%326, %c128_69] : memref<16x256xf32, #tpu.memory_space<vmem>>, vector<2x128xf32>
    %cst_70 = arith.constant dense<0.000000e+00> : vector<2x128xf32>
    %328 = tpu.matmul %311, %9, %cst_70 {dimension_numbers = #tpu.dot_dimension_numbers<[1], [0], [0], [1], [0, 0, 1, 1], [], []>} : vector<2x32xf32>, vector<32x128xf32>, vector<2x128xf32> -> vector<2x128xf32>
    %329 = arith.addf %324, %328 : vector<2x128xf32>
    %cst_71 = arith.constant dense<0.000000e+00> : vector<2x128xf32>
    %330 = tpu.matmul %317, %11, %cst_71 {dimension_numbers = #tpu.dot_dimension_numbers<[1], [0], [0], [1], [0, 0, 1, 1], [], []>} : vector<2x32xf32>, vector<32x128xf32>, vector<2x128xf32> -> vector<2x128xf32>
    %331 = arith.addf %327, %330 : vector<2x128xf32>
    %332 = vector.extract_strided_slice %329 {offsets = [0, 0], sizes = [2, 32], strides = [1, 1]} : vector<2x128xf32> to vector<2x32xf32>
    %333 = arith.negf %332 : vector<2x32xf32>
    %334 = math.exp %333 : vector<2x32xf32>
    %cst_72 = arith.constant 1.000000e+00 : f32
    %335 = vector.broadcast %cst_72 : f32 to vector<2x32xf32>
    %336 = arith.addf %335, %334 : vector<2x32xf32>
    %337 = arith.divf %335, %336 : vector<2x32xf32>
    %338 = vector.extract_strided_slice %329 {offsets = [0, 32], sizes = [2, 32], strides = [1, 1]} : vector<2x128xf32> to vector<2x32xf32>
    %339 = arith.negf %338 : vector<2x32xf32>
    %340 = math.exp %339 : vector<2x32xf32>
    %cst_73 = arith.constant 1.000000e+00 : f32
    %341 = vector.broadcast %cst_73 : f32 to vector<2x32xf32>
    %342 = arith.addf %341, %340 : vector<2x32xf32>
    %343 = arith.divf %341, %342 : vector<2x32xf32>
    %344 = vector.extract_strided_slice %329 {offsets = [0, 64], sizes = [2, 32], strides = [1, 1]} : vector<2x128xf32> to vector<2x32xf32>
    %345 = math.tanh %344 : vector<2x32xf32>
    %346 = vector.extract_strided_slice %329 {offsets = [0, 96], sizes = [2, 32], strides = [1, 1]} : vector<2x128xf32> to vector<2x32xf32>
    %347 = arith.negf %346 : vector<2x32xf32>
    %348 = math.exp %347 : vector<2x32xf32>
    %cst_74 = arith.constant 1.000000e+00 : f32
    %349 = vector.broadcast %cst_74 : f32 to vector<2x32xf32>
    %350 = arith.addf %349, %348 : vector<2x32xf32>
    %351 = arith.divf %349, %350 : vector<2x32xf32>
    %352 = arith.mulf %343, %314 : vector<2x32xf32>
    %353 = arith.mulf %337, %345 : vector<2x32xf32>
    %354 = arith.addf %352, %353 : vector<2x32xf32>
    %355 = math.tanh %354 : vector<2x32xf32>
    %356 = arith.mulf %351, %355 : vector<2x32xf32>
    %357 = vector.extract_strided_slice %331 {offsets = [0, 0], sizes = [2, 32], strides = [1, 1]} : vector<2x128xf32> to vector<2x32xf32>
    %358 = arith.negf %357 : vector<2x32xf32>
    %359 = math.exp %358 : vector<2x32xf32>
    %cst_75 = arith.constant 1.000000e+00 : f32
    %360 = vector.broadcast %cst_75 : f32 to vector<2x32xf32>
    %361 = arith.addf %360, %359 : vector<2x32xf32>
    %362 = arith.divf %360, %361 : vector<2x32xf32>
    %363 = vector.extract_strided_slice %331 {offsets = [0, 32], sizes = [2, 32], strides = [1, 1]} : vector<2x128xf32> to vector<2x32xf32>
    %364 = arith.negf %363 : vector<2x32xf32>
    %365 = math.exp %364 : vector<2x32xf32>
    %cst_76 = arith.constant 1.000000e+00 : f32
    %366 = vector.broadcast %cst_76 : f32 to vector<2x32xf32>
    %367 = arith.addf %366, %365 : vector<2x32xf32>
    %368 = arith.divf %366, %367 : vector<2x32xf32>
    %369 = vector.extract_strided_slice %331 {offsets = [0, 64], sizes = [2, 32], strides = [1, 1]} : vector<2x128xf32> to vector<2x32xf32>
    %370 = math.tanh %369 : vector<2x32xf32>
    %371 = vector.extract_strided_slice %331 {offsets = [0, 96], sizes = [2, 32], strides = [1, 1]} : vector<2x128xf32> to vector<2x32xf32>
    %372 = arith.negf %371 : vector<2x32xf32>
    %373 = math.exp %372 : vector<2x32xf32>
    %cst_77 = arith.constant 1.000000e+00 : f32
    %374 = vector.broadcast %cst_77 : f32 to vector<2x32xf32>
    %375 = arith.addf %374, %373 : vector<2x32xf32>
    %376 = arith.divf %374, %375 : vector<2x32xf32>
    %377 = arith.mulf %368, %320 : vector<2x32xf32>
    %378 = arith.mulf %362, %370 : vector<2x32xf32>
    %379 = arith.addf %377, %378 : vector<2x32xf32>
    %380 = math.tanh %379 : vector<2x32xf32>
    %381 = arith.mulf %376, %380 : vector<2x32xf32>
    %382 = vector.broadcast %c4_i32 : i32 to vector<2x1xi32>
    %383 = arith.cmpi sgt, %7, %382 : vector<2x1xi32>
    %384 = vector.broadcast %321 : i32 to vector<2x1xi32>
    %385 = arith.cmpi sgt, %7, %384 : vector<2x1xi32>
    %386 = vector.shape_cast %383 : vector<2x1xi1> to vector<2x1xi1>
    %387 = vector.broadcast %386 : vector<2x1xi1> to vector<2x32xi1>
    %388 = arith.select %387, %356, %311 : vector<2x32xi1>, vector<2x32xf32>
    %389 = vector.shape_cast %383 : vector<2x1xi1> to vector<2x1xi1>
    %390 = vector.broadcast %389 : vector<2x1xi1> to vector<2x32xi1>
    %391 = arith.select %390, %354, %314 : vector<2x32xi1>, vector<2x32xf32>
    %392 = vector.shape_cast %385 : vector<2x1xi1> to vector<2x1xi1>
    %393 = vector.broadcast %392 : vector<2x1xi1> to vector<2x32xi1>
    %394 = arith.select %393, %381, %317 : vector<2x32xi1>, vector<2x32xf32>
    %395 = vector.shape_cast %385 : vector<2x1xi1> to vector<2x1xi1>
    %396 = vector.broadcast %395 : vector<2x1xi1> to vector<2x32xi1>
    %397 = arith.select %396, %379, %320 : vector<2x32xi1>, vector<2x32xf32>
    %c5_i32 = arith.constant 5 : i32
    %c7_i32_78 = arith.constant 7 : i32
    %398 = arith.subi %c7_i32_78, %c5_i32 : i32
    %c2_i32_79 = arith.constant 2 : i32
    %399 = arith.muli %c5_i32, %c2_i32_79 : i32
    %400 = arith.index_cast %399 : i32 to index
    %c0_80 = arith.constant 0 : index
    %401 = vector.load %arg8[%400, %c0_80] : memref<16x256xf32, #tpu.memory_space<vmem>>, vector<2x128xf32>
    %c2_i32_81 = arith.constant 2 : i32
    %402 = arith.muli %398, %c2_i32_81 : i32
    %403 = arith.index_cast %402 : i32 to index
    %c128_82 = arith.constant 128 : index
    %404 = vector.load %arg8[%403, %c128_82] : memref<16x256xf32, #tpu.memory_space<vmem>>, vector<2x128xf32>
    %cst_83 = arith.constant dense<0.000000e+00> : vector<2x128xf32>
    %405 = tpu.matmul %388, %9, %cst_83 {dimension_numbers = #tpu.dot_dimension_numbers<[1], [0], [0], [1], [0, 0, 1, 1], [], []>} : vector<2x32xf32>, vector<32x128xf32>, vector<2x128xf32> -> vector<2x128xf32>
    %406 = arith.addf %401, %405 : vector<2x128xf32>
    %cst_84 = arith.constant dense<0.000000e+00> : vector<2x128xf32>
    %407 = tpu.matmul %394, %11, %cst_84 {dimension_numbers = #tpu.dot_dimension_numbers<[1], [0], [0], [1], [0, 0, 1, 1], [], []>} : vector<2x32xf32>, vector<32x128xf32>, vector<2x128xf32> -> vector<2x128xf32>
    %408 = arith.addf %404, %407 : vector<2x128xf32>
    %409 = vector.extract_strided_slice %406 {offsets = [0, 0], sizes = [2, 32], strides = [1, 1]} : vector<2x128xf32> to vector<2x32xf32>
    %410 = arith.negf %409 : vector<2x32xf32>
    %411 = math.exp %410 : vector<2x32xf32>
    %cst_85 = arith.constant 1.000000e+00 : f32
    %412 = vector.broadcast %cst_85 : f32 to vector<2x32xf32>
    %413 = arith.addf %412, %411 : vector<2x32xf32>
    %414 = arith.divf %412, %413 : vector<2x32xf32>
    %415 = vector.extract_strided_slice %406 {offsets = [0, 32], sizes = [2, 32], strides = [1, 1]} : vector<2x128xf32> to vector<2x32xf32>
    %416 = arith.negf %415 : vector<2x32xf32>
    %417 = math.exp %416 : vector<2x32xf32>
    %cst_86 = arith.constant 1.000000e+00 : f32
    %418 = vector.broadcast %cst_86 : f32 to vector<2x32xf32>
    %419 = arith.addf %418, %417 : vector<2x32xf32>
    %420 = arith.divf %418, %419 : vector<2x32xf32>
    %421 = vector.extract_strided_slice %406 {offsets = [0, 64], sizes = [2, 32], strides = [1, 1]} : vector<2x128xf32> to vector<2x32xf32>
    %422 = math.tanh %421 : vector<2x32xf32>
    %423 = vector.extract_strided_slice %406 {offsets = [0, 96], sizes = [2, 32], strides = [1, 1]} : vector<2x128xf32> to vector<2x32xf32>
    %424 = arith.negf %423 : vector<2x32xf32>
    %425 = math.exp %424 : vector<2x32xf32>
    %cst_87 = arith.constant 1.000000e+00 : f32
    %426 = vector.broadcast %cst_87 : f32 to vector<2x32xf32>
    %427 = arith.addf %426, %425 : vector<2x32xf32>
    %428 = arith.divf %426, %427 : vector<2x32xf32>
    %429 = arith.mulf %420, %391 : vector<2x32xf32>
    %430 = arith.mulf %414, %422 : vector<2x32xf32>
    %431 = arith.addf %429, %430 : vector<2x32xf32>
    %432 = math.tanh %431 : vector<2x32xf32>
    %433 = arith.mulf %428, %432 : vector<2x32xf32>
    %434 = vector.extract_strided_slice %408 {offsets = [0, 0], sizes = [2, 32], strides = [1, 1]} : vector<2x128xf32> to vector<2x32xf32>
    %435 = arith.negf %434 : vector<2x32xf32>
    %436 = math.exp %435 : vector<2x32xf32>
    %cst_88 = arith.constant 1.000000e+00 : f32
    %437 = vector.broadcast %cst_88 : f32 to vector<2x32xf32>
    %438 = arith.addf %437, %436 : vector<2x32xf32>
    %439 = arith.divf %437, %438 : vector<2x32xf32>
    %440 = vector.extract_strided_slice %408 {offsets = [0, 32], sizes = [2, 32], strides = [1, 1]} : vector<2x128xf32> to vector<2x32xf32>
    %441 = arith.negf %440 : vector<2x32xf32>
    %442 = math.exp %441 : vector<2x32xf32>
    %cst_89 = arith.constant 1.000000e+00 : f32
    %443 = vector.broadcast %cst_89 : f32 to vector<2x32xf32>
    %444 = arith.addf %443, %442 : vector<2x32xf32>
    %445 = arith.divf %443, %444 : vector<2x32xf32>
    %446 = vector.extract_strided_slice %408 {offsets = [0, 64], sizes = [2, 32], strides = [1, 1]} : vector<2x128xf32> to vector<2x32xf32>
    %447 = math.tanh %446 : vector<2x32xf32>
    %448 = vector.extract_strided_slice %408 {offsets = [0, 96], sizes = [2, 32], strides = [1, 1]} : vector<2x128xf32> to vector<2x32xf32>
    %449 = arith.negf %448 : vector<2x32xf32>
    %450 = math.exp %449 : vector<2x32xf32>
    %cst_90 = arith.constant 1.000000e+00 : f32
    %451 = vector.broadcast %cst_90 : f32 to vector<2x32xf32>
    %452 = arith.addf %451, %450 : vector<2x32xf32>
    %453 = arith.divf %451, %452 : vector<2x32xf32>
    %454 = arith.mulf %445, %397 : vector<2x32xf32>
    %455 = arith.mulf %439, %447 : vector<2x32xf32>
    %456 = arith.addf %454, %455 : vector<2x32xf32>
    %457 = math.tanh %456 : vector<2x32xf32>
    %458 = arith.mulf %453, %457 : vector<2x32xf32>
    %459 = vector.broadcast %c5_i32 : i32 to vector<2x1xi32>
    %460 = arith.cmpi sgt, %7, %459 : vector<2x1xi32>
    %461 = vector.broadcast %398 : i32 to vector<2x1xi32>
    %462 = arith.cmpi sgt, %7, %461 : vector<2x1xi32>
    %463 = vector.shape_cast %460 : vector<2x1xi1> to vector<2x1xi1>
    %464 = vector.broadcast %463 : vector<2x1xi1> to vector<2x32xi1>
    %465 = arith.select %464, %433, %388 : vector<2x32xi1>, vector<2x32xf32>
    %466 = vector.shape_cast %460 : vector<2x1xi1> to vector<2x1xi1>
    %467 = vector.broadcast %466 : vector<2x1xi1> to vector<2x32xi1>
    %468 = arith.select %467, %431, %391 : vector<2x32xi1>, vector<2x32xf32>
    %469 = vector.shape_cast %462 : vector<2x1xi1> to vector<2x1xi1>
    %470 = vector.broadcast %469 : vector<2x1xi1> to vector<2x32xi1>
    %471 = arith.select %470, %458, %394 : vector<2x32xi1>, vector<2x32xf32>
    %472 = vector.shape_cast %462 : vector<2x1xi1> to vector<2x1xi1>
    %473 = vector.broadcast %472 : vector<2x1xi1> to vector<2x32xi1>
    %474 = arith.select %473, %456, %397 : vector<2x32xi1>, vector<2x32xf32>
    %c6_i32 = arith.constant 6 : i32
    %c7_i32_91 = arith.constant 7 : i32
    %475 = arith.subi %c7_i32_91, %c6_i32 : i32
    %c2_i32_92 = arith.constant 2 : i32
    %476 = arith.muli %c6_i32, %c2_i32_92 : i32
    %477 = arith.index_cast %476 : i32 to index
    %c0_93 = arith.constant 0 : index
    %478 = vector.load %arg8[%477, %c0_93] : memref<16x256xf32, #tpu.memory_space<vmem>>, vector<2x128xf32>
    %c2_i32_94 = arith.constant 2 : i32
    %479 = arith.muli %475, %c2_i32_94 : i32
    %480 = arith.index_cast %479 : i32 to index
    %c128_95 = arith.constant 128 : index
    %481 = vector.load %arg8[%480, %c128_95] : memref<16x256xf32, #tpu.memory_space<vmem>>, vector<2x128xf32>
    %cst_96 = arith.constant dense<0.000000e+00> : vector<2x128xf32>
    %482 = tpu.matmul %465, %9, %cst_96 {dimension_numbers = #tpu.dot_dimension_numbers<[1], [0], [0], [1], [0, 0, 1, 1], [], []>} : vector<2x32xf32>, vector<32x128xf32>, vector<2x128xf32> -> vector<2x128xf32>
    %483 = arith.addf %478, %482 : vector<2x128xf32>
    %cst_97 = arith.constant dense<0.000000e+00> : vector<2x128xf32>
    %484 = tpu.matmul %471, %11, %cst_97 {dimension_numbers = #tpu.dot_dimension_numbers<[1], [0], [0], [1], [0, 0, 1, 1], [], []>} : vector<2x32xf32>, vector<32x128xf32>, vector<2x128xf32> -> vector<2x128xf32>
    %485 = arith.addf %481, %484 : vector<2x128xf32>
    %486 = vector.extract_strided_slice %483 {offsets = [0, 0], sizes = [2, 32], strides = [1, 1]} : vector<2x128xf32> to vector<2x32xf32>
    %487 = arith.negf %486 : vector<2x32xf32>
    %488 = math.exp %487 : vector<2x32xf32>
    %cst_98 = arith.constant 1.000000e+00 : f32
    %489 = vector.broadcast %cst_98 : f32 to vector<2x32xf32>
    %490 = arith.addf %489, %488 : vector<2x32xf32>
    %491 = arith.divf %489, %490 : vector<2x32xf32>
    %492 = vector.extract_strided_slice %483 {offsets = [0, 32], sizes = [2, 32], strides = [1, 1]} : vector<2x128xf32> to vector<2x32xf32>
    %493 = arith.negf %492 : vector<2x32xf32>
    %494 = math.exp %493 : vector<2x32xf32>
    %cst_99 = arith.constant 1.000000e+00 : f32
    %495 = vector.broadcast %cst_99 : f32 to vector<2x32xf32>
    %496 = arith.addf %495, %494 : vector<2x32xf32>
    %497 = arith.divf %495, %496 : vector<2x32xf32>
    %498 = vector.extract_strided_slice %483 {offsets = [0, 64], sizes = [2, 32], strides = [1, 1]} : vector<2x128xf32> to vector<2x32xf32>
    %499 = math.tanh %498 : vector<2x32xf32>
    %500 = vector.extract_strided_slice %483 {offsets = [0, 96], sizes = [2, 32], strides = [1, 1]} : vector<2x128xf32> to vector<2x32xf32>
    %501 = arith.negf %500 : vector<2x32xf32>
    %502 = math.exp %501 : vector<2x32xf32>
    %cst_100 = arith.constant 1.000000e+00 : f32
    %503 = vector.broadcast %cst_100 : f32 to vector<2x32xf32>
    %504 = arith.addf %503, %502 : vector<2x32xf32>
    %505 = arith.divf %503, %504 : vector<2x32xf32>
    %506 = arith.mulf %497, %468 : vector<2x32xf32>
    %507 = arith.mulf %491, %499 : vector<2x32xf32>
    %508 = arith.addf %506, %507 : vector<2x32xf32>
    %509 = math.tanh %508 : vector<2x32xf32>
    %510 = arith.mulf %505, %509 : vector<2x32xf32>
    %511 = vector.extract_strided_slice %485 {offsets = [0, 0], sizes = [2, 32], strides = [1, 1]} : vector<2x128xf32> to vector<2x32xf32>
    %512 = arith.negf %511 : vector<2x32xf32>
    %513 = math.exp %512 : vector<2x32xf32>
    %cst_101 = arith.constant 1.000000e+00 : f32
    %514 = vector.broadcast %cst_101 : f32 to vector<2x32xf32>
    %515 = arith.addf %514, %513 : vector<2x32xf32>
    %516 = arith.divf %514, %515 : vector<2x32xf32>
    %517 = vector.extract_strided_slice %485 {offsets = [0, 32], sizes = [2, 32], strides = [1, 1]} : vector<2x128xf32> to vector<2x32xf32>
    %518 = arith.negf %517 : vector<2x32xf32>
    %519 = math.exp %518 : vector<2x32xf32>
    %cst_102 = arith.constant 1.000000e+00 : f32
    %520 = vector.broadcast %cst_102 : f32 to vector<2x32xf32>
    %521 = arith.addf %520, %519 : vector<2x32xf32>
    %522 = arith.divf %520, %521 : vector<2x32xf32>
    %523 = vector.extract_strided_slice %485 {offsets = [0, 64], sizes = [2, 32], strides = [1, 1]} : vector<2x128xf32> to vector<2x32xf32>
    %524 = math.tanh %523 : vector<2x32xf32>
    %525 = vector.extract_strided_slice %485 {offsets = [0, 96], sizes = [2, 32], strides = [1, 1]} : vector<2x128xf32> to vector<2x32xf32>
    %526 = arith.negf %525 : vector<2x32xf32>
    %527 = math.exp %526 : vector<2x32xf32>
    %cst_103 = arith.constant 1.000000e+00 : f32
    %528 = vector.broadcast %cst_103 : f32 to vector<2x32xf32>
    %529 = arith.addf %528, %527 : vector<2x32xf32>
    %530 = arith.divf %528, %529 : vector<2x32xf32>
    %531 = arith.mulf %522, %474 : vector<2x32xf32>
    %532 = arith.mulf %516, %524 : vector<2x32xf32>
    %533 = arith.addf %531, %532 : vector<2x32xf32>
    %534 = math.tanh %533 : vector<2x32xf32>
    %535 = arith.mulf %530, %534 : vector<2x32xf32>
    %536 = vector.broadcast %c6_i32 : i32 to vector<2x1xi32>
    %537 = arith.cmpi sgt, %7, %536 : vector<2x1xi32>
    %538 = vector.broadcast %475 : i32 to vector<2x1xi32>
    %539 = arith.cmpi sgt, %7, %538 : vector<2x1xi32>
    %540 = vector.shape_cast %537 : vector<2x1xi1> to vector<2x1xi1>
    %541 = vector.broadcast %540 : vector<2x1xi1> to vector<2x32xi1>
    %542 = arith.select %541, %510, %465 : vector<2x32xi1>, vector<2x32xf32>
    %543 = vector.shape_cast %537 : vector<2x1xi1> to vector<2x1xi1>
    %544 = vector.broadcast %543 : vector<2x1xi1> to vector<2x32xi1>
    %545 = arith.select %544, %508, %468 : vector<2x32xi1>, vector<2x32xf32>
    %546 = vector.shape_cast %539 : vector<2x1xi1> to vector<2x1xi1>
    %547 = vector.broadcast %546 : vector<2x1xi1> to vector<2x32xi1>
    %548 = arith.select %547, %535, %471 : vector<2x32xi1>, vector<2x32xf32>
    %549 = vector.shape_cast %539 : vector<2x1xi1> to vector<2x1xi1>
    %550 = vector.broadcast %549 : vector<2x1xi1> to vector<2x32xi1>
    %551 = arith.select %550, %533, %474 : vector<2x32xi1>, vector<2x32xf32>
    %c7_i32_104 = arith.constant 7 : i32
    %c7_i32_105 = arith.constant 7 : i32
    %552 = arith.subi %c7_i32_105, %c7_i32_104 : i32
    %c2_i32_106 = arith.constant 2 : i32
    %553 = arith.muli %c7_i32_104, %c2_i32_106 : i32
    %554 = arith.index_cast %553 : i32 to index
    %c0_107 = arith.constant 0 : index
    %555 = vector.load %arg8[%554, %c0_107] : memref<16x256xf32, #tpu.memory_space<vmem>>, vector<2x128xf32>
    %c2_i32_108 = arith.constant 2 : i32
    %556 = arith.muli %552, %c2_i32_108 : i32
    %557 = arith.index_cast %556 : i32 to index
    %c128_109 = arith.constant 128 : index
    %558 = vector.load %arg8[%557, %c128_109] : memref<16x256xf32, #tpu.memory_space<vmem>>, vector<2x128xf32>
    %cst_110 = arith.constant dense<0.000000e+00> : vector<2x128xf32>
    %559 = tpu.matmul %542, %9, %cst_110 {dimension_numbers = #tpu.dot_dimension_numbers<[1], [0], [0], [1], [0, 0, 1, 1], [], []>} : vector<2x32xf32>, vector<32x128xf32>, vector<2x128xf32> -> vector<2x128xf32>
    %560 = arith.addf %555, %559 : vector<2x128xf32>
    %cst_111 = arith.constant dense<0.000000e+00> : vector<2x128xf32>
    %561 = tpu.matmul %548, %11, %cst_111 {dimension_numbers = #tpu.dot_dimension_numbers<[1], [0], [0], [1], [0, 0, 1, 1], [], []>} : vector<2x32xf32>, vector<32x128xf32>, vector<2x128xf32> -> vector<2x128xf32>
    %562 = arith.addf %558, %561 : vector<2x128xf32>
    %563 = vector.extract_strided_slice %560 {offsets = [0, 0], sizes = [2, 32], strides = [1, 1]} : vector<2x128xf32> to vector<2x32xf32>
    %564 = arith.negf %563 : vector<2x32xf32>
    %565 = math.exp %564 : vector<2x32xf32>
    %cst_112 = arith.constant 1.000000e+00 : f32
    %566 = vector.broadcast %cst_112 : f32 to vector<2x32xf32>
    %567 = arith.addf %566, %565 : vector<2x32xf32>
    %568 = arith.divf %566, %567 : vector<2x32xf32>
    %569 = vector.extract_strided_slice %560 {offsets = [0, 32], sizes = [2, 32], strides = [1, 1]} : vector<2x128xf32> to vector<2x32xf32>
    %570 = arith.negf %569 : vector<2x32xf32>
    %571 = math.exp %570 : vector<2x32xf32>
    %cst_113 = arith.constant 1.000000e+00 : f32
    %572 = vector.broadcast %cst_113 : f32 to vector<2x32xf32>
    %573 = arith.addf %572, %571 : vector<2x32xf32>
    %574 = arith.divf %572, %573 : vector<2x32xf32>
    %575 = vector.extract_strided_slice %560 {offsets = [0, 64], sizes = [2, 32], strides = [1, 1]} : vector<2x128xf32> to vector<2x32xf32>
    %576 = math.tanh %575 : vector<2x32xf32>
    %577 = vector.extract_strided_slice %560 {offsets = [0, 96], sizes = [2, 32], strides = [1, 1]} : vector<2x128xf32> to vector<2x32xf32>
    %578 = arith.negf %577 : vector<2x32xf32>
    %579 = math.exp %578 : vector<2x32xf32>
    %cst_114 = arith.constant 1.000000e+00 : f32
    %580 = vector.broadcast %cst_114 : f32 to vector<2x32xf32>
    %581 = arith.addf %580, %579 : vector<2x32xf32>
    %582 = arith.divf %580, %581 : vector<2x32xf32>
    %583 = arith.mulf %574, %545 : vector<2x32xf32>
    %584 = arith.mulf %568, %576 : vector<2x32xf32>
    %585 = arith.addf %583, %584 : vector<2x32xf32>
    %586 = math.tanh %585 : vector<2x32xf32>
    %587 = arith.mulf %582, %586 : vector<2x32xf32>
    %588 = vector.extract_strided_slice %562 {offsets = [0, 0], sizes = [2, 32], strides = [1, 1]} : vector<2x128xf32> to vector<2x32xf32>
    %589 = arith.negf %588 : vector<2x32xf32>
    %590 = math.exp %589 : vector<2x32xf32>
    %cst_115 = arith.constant 1.000000e+00 : f32
    %591 = vector.broadcast %cst_115 : f32 to vector<2x32xf32>
    %592 = arith.addf %591, %590 : vector<2x32xf32>
    %593 = arith.divf %591, %592 : vector<2x32xf32>
    %594 = vector.extract_strided_slice %562 {offsets = [0, 32], sizes = [2, 32], strides = [1, 1]} : vector<2x128xf32> to vector<2x32xf32>
    %595 = arith.negf %594 : vector<2x32xf32>
    %596 = math.exp %595 : vector<2x32xf32>
    %cst_116 = arith.constant 1.000000e+00 : f32
    %597 = vector.broadcast %cst_116 : f32 to vector<2x32xf32>
    %598 = arith.addf %597, %596 : vector<2x32xf32>
    %599 = arith.divf %597, %598 : vector<2x32xf32>
    %600 = vector.extract_strided_slice %562 {offsets = [0, 64], sizes = [2, 32], strides = [1, 1]} : vector<2x128xf32> to vector<2x32xf32>
    %601 = math.tanh %600 : vector<2x32xf32>
    %602 = vector.extract_strided_slice %562 {offsets = [0, 96], sizes = [2, 32], strides = [1, 1]} : vector<2x128xf32> to vector<2x32xf32>
    %603 = arith.negf %602 : vector<2x32xf32>
    %604 = math.exp %603 : vector<2x32xf32>
    %cst_117 = arith.constant 1.000000e+00 : f32
    %605 = vector.broadcast %cst_117 : f32 to vector<2x32xf32>
    %606 = arith.addf %605, %604 : vector<2x32xf32>
    %607 = arith.divf %605, %606 : vector<2x32xf32>
    %608 = arith.mulf %599, %551 : vector<2x32xf32>
    %609 = arith.mulf %593, %601 : vector<2x32xf32>
    %610 = arith.addf %608, %609 : vector<2x32xf32>
    %611 = math.tanh %610 : vector<2x32xf32>
    %612 = arith.mulf %607, %611 : vector<2x32xf32>
    %613 = vector.broadcast %c7_i32_104 : i32 to vector<2x1xi32>
    %614 = arith.cmpi sgt, %7, %613 : vector<2x1xi32>
    %615 = vector.broadcast %552 : i32 to vector<2x1xi32>
    %616 = arith.cmpi sgt, %7, %615 : vector<2x1xi32>
    %617 = vector.shape_cast %614 : vector<2x1xi1> to vector<2x1xi1>
    %618 = vector.broadcast %617 : vector<2x1xi1> to vector<2x32xi1>
    %619 = arith.select %618, %587, %542 : vector<2x32xi1>, vector<2x32xf32>
    %620 = vector.shape_cast %614 : vector<2x1xi1> to vector<2x1xi1>
    %621 = vector.broadcast %620 : vector<2x1xi1> to vector<2x32xi1>
    %622 = arith.select %621, %585, %545 : vector<2x32xi1>, vector<2x32xf32>
    %623 = vector.shape_cast %616 : vector<2x1xi1> to vector<2x1xi1>
    %624 = vector.broadcast %623 : vector<2x1xi1> to vector<2x32xi1>
    %625 = arith.select %624, %612, %548 : vector<2x32xi1>, vector<2x32xf32>
    %626 = vector.shape_cast %616 : vector<2x1xi1> to vector<2x1xi1>
    %627 = vector.broadcast %626 : vector<2x1xi1> to vector<2x32xi1>
    %628 = arith.select %627, %610, %551 : vector<2x32xi1>, vector<2x32xf32>
    %c8_i32 = arith.constant 8 : i32
    %c0_118 = arith.constant 0 : index
    %c0_119 = arith.constant 0 : index
    %c0_120 = arith.constant 0 : index
    %629 = vector.load %arg5[%c0_118, %c0_119, %c0_120] : memref<2x32x4xf32, #tpu.memory_space<vmem>>, vector<1x32x4xf32>
    %630 = vector.shape_cast %629 : vector<1x32x4xf32> to vector<32x4xf32>
    %cst_121 = arith.constant dense<0.000000e+00> : vector<2x4xf32>
    %631 = tpu.matmul %619, %630, %cst_121 {dimension_numbers = #tpu.dot_dimension_numbers<[1], [0], [0], [1], [0, 0, 1, 1], [], []>} : vector<2x32xf32>, vector<32x4xf32>, vector<2x4xf32> -> vector<2x4xf32>
    %c1_122 = arith.constant 1 : index
    %c0_123 = arith.constant 0 : index
    %c0_124 = arith.constant 0 : index
    %632 = vector.load %arg5[%c1_122, %c0_123, %c0_124] : memref<2x32x4xf32, #tpu.memory_space<vmem>>, vector<1x32x4xf32>
    %633 = vector.shape_cast %632 : vector<1x32x4xf32> to vector<32x4xf32>
    %cst_125 = arith.constant dense<0.000000e+00> : vector<2x4xf32>
    %634 = tpu.matmul %625, %633, %cst_125 {dimension_numbers = #tpu.dot_dimension_numbers<[1], [0], [0], [1], [0, 0, 1, 1], [], []>} : vector<2x32xf32>, vector<32x4xf32>, vector<2x4xf32> -> vector<2x4xf32>
    %635 = arith.addf %631, %634 : vector<2x4xf32>
    %c0_126 = arith.constant 0 : index
    %c0_127 = arith.constant 0 : index
    %636 = vector.load %arg6[%c0_126, %c0_127] : memref<1x4xf32, #tpu.memory_space<vmem>>, vector<1x4xf32>
    %637 = vector.broadcast %636 : vector<1x4xf32> to vector<2x4xf32>
    %638 = arith.addf %635, %637 : vector<2x4xf32>
    %c0_128 = arith.constant 0 : index
    %c0_129 = arith.constant 0 : index
    %639 = vector.load %arg7[%c0_128, %c0_129] : memref<2x4xf32, #tpu.memory_space<vmem>>, vector<2x4xf32>
    tpu.vector_store %arg7[%c0_128, %c0_129], %638 {strides = array<i32>} : memref<2x4xf32, #tpu.memory_space<vmem>>, vector<2x4xf32>,
    return
  }
}

</mosaic_0001>

<bundles_post_ra>
// kernel: lstm_model_forward.1
= control target key start
LH: loop header
LB: loop body
LE: loop exit
PB: predicated region body
PF: predicated region fallthrough
CT: control target
= control target key end

     0   :  { %v2724_v4 = vmov 0.0   ;;  %vm2725_vm0 = vmmov 0   ;;  %vm49_vm1 = vcmask 261120   ;;  %s3411_s0 = inlined_call_operand.vmem [shape: s32[2,1], index: 0, kind: input, shape index: {}]   ;;  %s3412_s1 = inlined_call_operand.vmem [shape: f32[16,32], index: 1, kind: input, shape index: {}]   ;;  %s3413_s2 = inlined_call_operand.vmem [shape: f32[32,256], index: 2, kind: input, shape index: {}]   ;;  %s3414_s3 = inlined_call_operand.vmem [shape: f32[2,32,128], index: 3, kind: input, shape index: {}]   ;;  %s3415_s4 = inlined_call_operand.vmem [shape: f32[1,256], index: 4, kind: input, shape index: {}]   ;;  %s3416_s5 = inlined_call_operand.vmem [shape: f32[2,32,4], index: 5, kind: input, shape index: {}]   ;;  %s3417_s6 = inlined_call_operand.vmem [shape: f32[1,4], index: 6, kind: input, shape index: {}]   ;;  %s3418_s7 = inlined_call_operand.hbm [shape: f32[2,4], index: 7, kind: output, shape index: {}]  }
   0x1   :  { %v36_v0 = vld [vmem:[%s3413_s2 + $0x38] sm:$0xff]  ;;  %v35_v1 = vld [vmem:[%s3413_s2 + $0x30] sm:$0xff]  ;;  %v34_v2 = vld [vmem:[%s3413_s2 + $0x28] sm:$0xff]  ;;  %120 = vmatprep.mubr.f32.mxu0 %v2724_v4  ;;  %2359 = vmatprep.subr.mxu1 %v2724_v4 }
   0x2   :  { %80 = vmatprep.subr.mxu0 %v36_v0  ;;  %v33_v3 = vld [vmem:[%s3413_s2 + $0x20] sm:$0xff]  ;;  %v32_v5 = vld [vmem:[%s3413_s2 + $0x18] sm:$0xff]  ;;  %v31_v6 = vld [vmem:[%s3413_s2 + $0x10] sm:$0xff]  ;;  %2367 = vmatprep.mubr.msk.f32.mxu1 %vm2725_vm0, %v2724_v4 }
   0x3   :  { %81 = vmatpush1.msra.mxu0 %v35_v1  ;;  %v2794_v7 = vld [vmem:[%s3414_s3 + $0x18] sm:$0xff]  ;;  %v2799_v8 = vld [vmem:[%s3414_s3 + $0x10] sm:$0xff]  ;;  %v30_v9 = vld [vmem:[%s3413_s2 + $0x8] sm:$0xff] }
   0x4   :  { %82 = vmatprep.subr.mxu0 %v34_v2  ;;  %2360 = vmatpush3.msra.mxu1 %v2794_v7  ;;  %v29_v10 = vld [vmem:[%s3413_s2] sm:$0xff]  ;;  %v2814_v11 = vld [vmem:[%s3414_s3 + $0x8] sm:$0xff] }
   0x5   :  { %83 = vmatpush1.msra.mxu0 %v33_v3  ;;  %2361 = vmatprep.subr.mxu1 %v2724_v4  ;;  %v27_v12 = vld [vmem:[%s3412_s1] sm:$0xff] }
   0x6   :  { %84 = vmatprep.subr.mxu0 %v32_v5  ;;  %2362 = vmatpush3.msra.mxu1 %v2799_v8 }
   0x7   :  { %85 = vmatpush1.msra.mxu0 %v31_v6 }
   0x8   :  { %12 = vsyncpa [#allocation4], 0  ;;  %86 = vmatprep.subr.mxu0 %v30_v9  ;;  %2363 = vmatprep.subr.mxu1 %v2724_v4  ;;  %v2825_v13 = vld [vmem:[%s3414_s3 + $0x38] sm:$0xff]  ;;  %v2830_v14 = vld [vmem:[%s3414_s3] sm:$0xff]  ;;  %v2726_v19 = vmov 0   ;;  %v39_v20 = vlaneseq  ;;  %s2729_s16 = smov 96  }
   0x9   :  { %87 = vmatpush1.msra.mxu0 %v29_v10  ;;  %2364 = vmatpush3.msra.mxu1 %v2814_v11  ;;  %v28_v15 = vld [vmem:[%s3412_s1 + $0x8] sm:$0xff]  ;;  %v2844_v16 = vld [vmem:[%s3414_s3 + $0x30] sm:$0xff]  ;;  %v2862_v18 = vld [vmem:[%s3414_s3 + $0x20] sm:$0xff] }
   0xa   :  { %2226 = vmatmul.mubr.msk.f32.vlgmr.msra.gmra.mxu0 %vm49_vm1, %v27_v12  ;;  %2370 = vmatprep.subr.mxu0 %v2724_v4  ;;  %v2852_v17 = vld [vmem:[%s3414_s3 + $0x28] sm:$0xff]  ;;  %v40_v21 = vshrl.u32 %v39_v20, 7  ;;  %v37_v23 = vld [vmem:[%s3415_s4] sm:$0x3]  ;;  %s2727_s4 = smov 64  }
   0xb   :  { %126 = vmatprep.mubr.f32.mxu0 %v2724_v4  ;;  %2365 = vmatprep.subr.mxu1 %v2724_v4  ;;  %v2898_v45 = vld [vmem:[%s3411_s0] sm:$0x3]  ;;  %s2728_s0 = smov 32  }
   0xc   :  { %2371 = vmatpush3.msra.mxu0 %v2825_v13  ;;  %2366 = vmatpush3.msra.mxu1 %v2830_v14  ;;  %v41_v22 = vsub.s32 0, %v40_v21  ;;  %v45_v24 = vsub.s32 1, %v40_v21  ;;  %vm345_vm2 = vcmp.gt.s32.totalorder %v2898_v45, 0  ;;  %vm346_vm3 = vcmp.gt.s32.totalorder %v2898_v45, 7 }
   0xd   :  { %2372 = vmatprep.subr.mxu0 %v2724_v4  ;;  %2368 = vmatmul.mubr.f32.vlgmr.msra.gmra.mxu1 %v2724_v4  ;;  %v347_v47 = vsel %vm345_vm2, 1, %v2726_v19  ;;  %v354_v54 = vsel %vm346_vm3, 1, %v2726_v19  ;;  %vm585_vm6 = vcmp.gt.s32.totalorder %v2898_v45, 1  ;;  %vm586_vm7 = vcmp.gt.s32.totalorder %v2898_v45, 6 }
   0xe   :  { %2227 = vmatmul.mubr.msk.f32.gmra.mxu0 %vm49_vm1, %v28_v15  ;;  %2381 = vmatprep.subr.mxu1 %v2724_v4  ;;  %v42_v25 = vrot.slane %v37_v23, %v41_v22  ;;  %v46_v26 = vrot.slane %v37_v23, %v45_v24  ;;  %vm839_vm10 = vcmp.gt.s32.totalorder %v2898_v45, 2  ;;  %vm840_vm11 = vcmp.gt.s32.totalorder %v2898_v45, 5 }
   0xf   :  { %2373 = vmatpush3.msra.mxu0 %v2844_v16  ;;  %2378 = vmatprep.mubr.msk.f32.mxu0 %vm2725_vm0, %v2724_v4  ;;  %vm1086_vm14 = vcmp.gt.s32.totalorder %v2898_v45, 4  ;;  %vm1085_vm15 = vcmp.gt.s32.totalorder %v2898_v45, 3 }
  0x10   :  { %2374 = vmatprep.subr.mxu0 %v2724_v4  ;;  %2382 = vmatpush3.msra.mxu1 %v2794_v7 }
  0x11   :  { %2375 = vmatpush3.msra.mxu0 %v2852_v17  ;;  %2383 = vmatprep.subr.mxu1 %v2724_v4 }
  0x12   :  { %2376 = vmatprep.subr.mxu0 %v2724_v4  ;;  %2384 = vmatpush3.msra.mxu1 %v2799_v8 }
  0x13   :  { %2377 = vmatpush3.msra.mxu0 %v2862_v18  ;;  %2385 = vmatprep.subr.mxu1 %v2724_v4 }
  0x14   :  { %2379 = vmatmul.mubr.f32.vlgmr.msra.gmra.mxu0 %v2724_v4  ;;  %2386 = vmatpush3.msra.mxu1 %v2814_v11 }
  0x15   :  { %2387 = vmatprep.subr.mxu1 %v2724_v4  ;;  %2389 = vmatprep.mubr.msk.f32.mxu1 %vm2725_vm0, %v2724_v4 }
  0x16   :  { %2388 = vmatpush3.msra.mxu1 %v2830_v14  ;;  %2392 = vmatprep.subr.mxu0 %v2724_v4 }
  0x17   :  { %2393 = vmatpush3.msra.mxu0 %v2825_v13  ;;  %2400 = vmatprep.mubr.msk.f32.mxu0 %vm2725_vm0, %v2724_v4 }
  0x18   :  { %2394 = vmatprep.subr.mxu0 %v2724_v4  ;;  %2403 = vmatprep.subr.mxu1 %v2724_v4 }
  0x19   :  { %2395 = vmatpush3.msra.mxu0 %v2844_v16  ;;  %2564 = vset.pattern.permute.xlu0 %v2726_v19 }
  0x1a   :  { %2396 = vmatprep.subr.mxu0 %v2724_v4  ;;  %2565 = vset.pattern.permute.xlu1 %v2726_v19 }
  0x1b   :  { %2397 = vmatpush3.msra.mxu0 %v2852_v17 }
  0x1c   :  { %2398 = vmatprep.subr.mxu0 %v2724_v4 }
  0x1d   :  { %2399 = vmatpush3.msra.mxu0 %v2862_v18 }
  0x1e   :  { %2414 = vmatprep.subr.mxu0 %v2724_v4 }
  0xca   :  { %v122_v27 = vpop.f32.mrf.mxu0 }
  0xcb   :  { %v123_v28 = vadd.f32 %v122_v27, %v42_v25 }
  0xcc   :  { %v124_v29 = vpop.f32.mrf.mxu0 }
  0xcd   :  { %133 = vst [vmem:[#allocation2 + $0x10] sm:$0xff] %v123_v28  ;;  %v125_v30 = vadd.f32 %v124_v29, %v46_v26  ;;  %v218_v31 = vpop.f32.mrf.mxu1 }
  0xce   :  { %v128_v32 = vpop.f32.mrf.mxu0 }
  0xcf   :  { %134 = vst [vmem:[#allocation2] sm:$0xff] %v125_v30  ;;  %v129_v33 = vadd.f32 %v128_v32, %v42_v25  ;;  %v2369_v34 = vpop.f32.mrf.mxu1 }
  0xd0   :  { %v130_v35 = vpop.f32.mrf.mxu0 }
  0xd1   :  { %135 = vst [vmem:[#allocation2 + $0x18] sm:$0xff] %v129_v33  ;;  %v131_v36 = vadd.f32 %v130_v35, %v46_v26 }
  0xd3   :  { %136 = vst [vmem:[#allocation2 + $0x8] sm:$0xff] %v131_v36 }
  0xd4   :  { %v147_v37 = vld [vmem:[#allocation2 + $0x10] sm:$0x3]  ;;  %v289_v38 = vpop.f32.mrf.mxu0  ;;  %v371_v29 = vld [vmem:[#allocation2 + $0x10] sm:$0xc] }
  0xd5   :  { %v222_v39 = vadd.f32 %v218_v31, %v147_v37  ;;  %v294_v41 = vrot.slane %v289_v38, 2 }
  0xd6   :  { %v2380_v40 = vpop.f32.mrf.mxu0 }
  0xd7   :  { %2566 = vtanh.f32 %v222_v39  ;;  %v2232_v48 = vmul.f32 -1.442695, %v222_v39 }
  0xda   :  { %v148_v42 = vld [vmem:[#allocation2 + $0x8] sm:$0xc0]  ;;  %v372_v34 = vld [vmem:[#allocation2 + $0x8] sm:$0x30] }
  0xdb   :  { %v296_v43 = vadd.f32 %v294_v41, %v148_v42 }
  0xdd   :  { %2568 = vtanh.f32 %v296_v43  ;;  %v2233_v49 = vmul.f32 -1.442695, %v296_v43 }
  0xde   :  { %2570 = vpow2.f32 %v2232_v48 }
  0xdf   :  { %2572 = vpow2.f32 %v2233_v49 }
  0xe4   :  { %v2567_v44 = vpop.eup %2566 }
  0xe5   :  { %306 = vrot.lane.b32.xlu0 %v2567_v44, %s2727_s4 }
  0xea   :  { %v2569_v46 = vpop.eup %2568 }
  0xeb   :  { %330 = vrot.lane.b32.xlu0 %v2569_v46, %s2727_s4  ;;  %v2571_v50 = vpop.eup %2570 }
  0xec   :  { %v300_v51 = vadd.f32 1.0, %v2571_v50  ;;  %v2573_v52 = vpop.eup %2572 }
  0xed   :  { %v324_v53 = vadd.f32 1.0, %v2573_v52 }
  0xee   :  { %2574 = vrcp.f32 %v300_v51 }
  0xef   :  { %349 = vperm.xlu0 %2564, %v347_v47   ;;  %2576 = vrcp.f32 %v324_v53 }
  0xf3   :  { %356 = vperm.xlu0 %2564, %v354_v54  }
  0xfb   :  { %v2575_v55 = vpop.eup %2574 }
  0xfc   :  { %v2577_v58 = vpop.eup %2576  ;;  %v304_v61 = vmul.f32 0.0, %v2575_v55 }
  0xfd   :  { %v328_v0 = vmul.f32 0.0, %v2577_v58 }
 0x157   :  { %v307_v56 = vpop.permute.xlu0 %306 }
 0x158   :  { %v309_v57 = vmul.f32 %v2575_v55, %v307_v56 }
 0x15a   :  { %311 = vrot.lane.b32.xlu1 %v309_v57, %s2728_s0 }
 0x15d   :  { %v331_v59 = vpop.permute.xlu0 %330 }
 0x15e   :  { %v333_v60 = vmul.f32 %v2577_v58, %v331_v59 }
 0x160   :  { %335 = vrot.lane.b32.xlu1 %v333_v60, %s2728_s0 }
 0x16a   :  { %v2912_v6 = vpop.permute.xlu0 %349 }
 0x16b   :  { %vm351_vm4 = vcmp.eq.s32.totalorder %v2912_v6, 1  ;;  %v2268_v6 = vld [vmem:[%s3417_s6] ss:$0 sm:$0xff] }
 0x16e   :  { %v2927_v24 = vpop.permute.xlu0 %356 }
 0x16f   :  { %vm358_vm5 = vcmp.eq.s32.totalorder %v2927_v24, 1 }
 0x1cc   :  { %v312_v62 = vpop.permute.xlu1 %311 }
 0x1cd   :  { %v2907_v63 = vadd.f32 %v312_v62, %v304_v61 }
 0x1cf   :  { %2578 = vtanh.f32 %v2907_v63 }
 0x1d2   :  { %v336_v1 = vpop.permute.xlu1 %335 }
 0x1d3   :  { %v338_v2 = vadd.f32 %v336_v1, %v328_v0 }
 0x1d5   :  { %2580 = vtanh.f32 %v338_v2  ;;  %v366_v22 = vrot.slane %v338_v2, 6  ;;  %v587_v2 = vsel %vm585_vm6, 1, %v2726_v19 }
 0x1dc   :  { %v2579_v3 = vpop.eup %2578 }
 0x1dd   :  { %317 = vrot.lane.b32.xlu1 %v2579_v3, %s2727_s4  ;;  %v608_v3 = vsel %vm586_vm7, 1, %v2726_v19 }
 0x1e2   :  { %v2581_v5 = vpop.eup %2580 }
 0x1e3   :  { %341 = vrot.lane.b32.xlu1 %v2581_v5, %s2727_s4 }
 0x24f   :  { %v318_v9 = vpop.permute.xlu1 %317 }
 0x250   :  { %v320_v10 = vmul.f32 %v2575_v55, %v318_v9  ;;  %v353_v55 = vsel %vm351_vm4, %v2907_v63, 0.0 }
 0x251   :  { %v537_v56 = vrot.slane %v353_v55, 6 }
 0x252   :  { %v352_v12 = vsel %vm351_vm4, %v320_v10, 0.0 }
 0x253   :  { %374 = vrot.lane.b32.xlu1 %v352_v12, %s2728_s0 }
 0x255   :  { %v342_v15 = vpop.permute.xlu1 %341 }
 0x256   :  { %v344_v20 = vmul.f32 %v2577_v58, %v342_v15 }
 0x258   :  { %v360_v21 = vrot.slane %v344_v20, 6 }
 0x25a   :  { %361 = vrot.lane.b32.xlu0 %v360_v21, %s2728_s0 }
 0x25e   :  { %367 = vrot.lane.b32.xlu0 %v366_v22, %s2729_s16 }
 0x2c5   :  { %v2920_v23 = vpop.permute.xlu1 %374 }
 0x2c6   :  { %2390 = vmatmul.mubr.msk.f32.vlgmr.msra.gmra.mxu1 %vm49_vm1, %v2920_v23 }
 0x2c7   :  { %2404 = vmatpush3.msra.mxu1 %v2794_v7  ;;  %2411 = vmatprep.mubr.msk.f32.mxu1 %vm2725_vm0, %v2724_v4 }
 0x2c8   :  { %2405 = vmatprep.subr.mxu1 %v2724_v4 }
 0x2c9   :  { %2406 = vmatpush3.msra.mxu1 %v2799_v8 }
 0x2ca   :  { %2407 = vmatprep.subr.mxu1 %v2724_v4 }
 0x2cb   :  { %2408 = vmatpush3.msra.mxu1 %v2814_v11 }
 0x2cc   :  { %v362_v25 = vpop.permute.xlu0 %361  ;;  %2409 = vmatprep.subr.mxu1 %v2724_v4 }
 0x2cd   :  { %v2937_v26 = vsel %vm358_vm5, %v362_v25, 0.0  ;;  %2410 = vmatpush3.msra.mxu1 %v2830_v14 }
 0x2ce   :  { %2401 = vmatmul.mubr.msk.f32.vlgmr.msra.gmra.mxu0 %vm49_vm1, %v2937_v26  ;;  %2425 = vmatprep.subr.mxu1 %v2724_v4 }
 0x2cf   :  { %2415 = vmatpush3.msra.mxu0 %v2825_v13  ;;  %2422 = vmatprep.mubr.msk.f32.mxu0 %vm2725_vm0, %v2724_v4 }
 0x2d0   :  { %2416 = vmatprep.subr.mxu0 %v2724_v4  ;;  %v368_v38 = vpop.permute.xlu0 %367 }
 0x2d1   :  { %2417 = vmatpush3.msra.mxu0 %v2844_v16  ;;  %v2956_v40 = vsel %vm358_vm5, %v368_v38, 0.0 }
 0x2d2   :  { %2418 = vmatprep.subr.mxu0 %v2724_v4  ;;  %v564_v41 = vrot.slane %v2956_v40, 4 }
 0x2d3   :  { %2419 = vmatpush3.msra.mxu0 %v2852_v17 }
 0x2d4   :  { %2420 = vmatprep.subr.mxu0 %v2724_v4 }
 0x2d5   :  { %2421 = vmatpush3.msra.mxu0 %v2862_v18 }
 0x2d6   :  { %2436 = vmatprep.subr.mxu0 %v2724_v4 }
 0x386   :  { %v444_v27 = vpop.f32.mrf.mxu1 }
 0x387   :  { %v449_v28 = vrot.slane %v444_v27, 6 }
 0x388   :  { %v2391_v30 = vpop.f32.mrf.mxu1 }
 0x389   :  { %v451_v31 = vadd.f32 %v449_v28, %v371_v29 }
 0x38b   :  { %2582 = vtanh.f32 %v451_v31  ;;  %v2236_v42 = vmul.f32 -1.442695, %v451_v31 }
 0x38e   :  { %v521_v32 = vpop.f32.mrf.mxu0 }
 0x38f   :  { %v526_v33 = vrot.slane %v521_v32, 4 }
 0x390   :  { %v2402_v35 = vpop.f32.mrf.mxu0 }
 0x391   :  { %v528_v36 = vadd.f32 %v526_v33, %v372_v34 }
 0x393   :  { %2584 = vtanh.f32 %v528_v36  ;;  %v2237_v43 = vmul.f32 -1.442695, %v528_v36 }
 0x394   :  { %2586 = vpow2.f32 %v2236_v42 }
 0x395   :  { %2588 = vpow2.f32 %v2237_v43 }
 0x398   :  { %v2583_v37 = vpop.eup %2582 }
 0x399   :  { %541 = vrot.lane.b32.xlu1 %v2583_v37, %s2727_s4 }
 0x3a0   :  { %v2585_v39 = vpop.eup %2584 }
 0x3a1   :  { %570 = vrot.lane.b32.xlu1 %v2585_v39, %s2727_s4  ;;  %v2587_v44 = vpop.eup %2586  ;;  %v625_v39 = vld [vmem:[#allocation2 + $0x10] sm:$0x30] }
 0x3a2   :  { %v532_v46 = vadd.f32 1.0, %v2587_v44  ;;  %v2589_v47 = vpop.eup %2588 }
 0x3a3   :  { %v559_v48 = vadd.f32 1.0, %v2589_v47 }
 0x3a4   :  { %2590 = vrcp.f32 %v532_v46  ;;  %v626_v46 = vld [vmem:[#allocation2 + $0x8] sm:$0xc] }
 0x3a5   :  { %565 = vrot.lane.b32.xlu1 %v564_v41, %s2728_s0  ;;  %2592 = vrcp.f32 %v559_v48 }
 0x3b1   :  { %v2591_v49 = vpop.eup %2590 }
 0x3b2   :  { %v2593_v52 = vpop.eup %2592  ;;  %v539_v57 = vmul.f32 %v2591_v49, %v537_v56 }
 0x40b   :  { %v542_v50 = vpop.permute.xlu1 %541 }
 0x40c   :  { %v544_v51 = vmul.f32 %v2591_v49, %v542_v50 }
 0x40e   :  { %546 = vrot.lane.b32.xlu0 %v544_v51, %s2728_s0 }
 0x413   :  { %v571_v53 = vpop.permute.xlu1 %570 }
 0x414   :  { %v573_v54 = vmul.f32 %v2593_v52, %v571_v53 }
 0x416   :  { %575 = vrot.lane.b32.xlu0 %v573_v54, %s2728_s0 }
 0x417   :  { %v566_v60 = vpop.permute.xlu1 %565 }
 0x418   :  { %v568_v61 = vmul.f32 %v2593_v52, %v566_v60 }
 0x480   :  { %v547_v58 = vpop.permute.xlu0 %546 }
 0x481   :  { %v549_v59 = vadd.f32 %v547_v58, %v539_v57 }
 0x483   :  { %2594 = vtanh.f32 %v549_v59  ;;  %v600_v12 = vrot.slane %v549_v59, 2 }
 0x488   :  { %v576_v62 = vpop.permute.xlu0 %575 }
 0x489   :  { %v578_v0 = vadd.f32 %v576_v62, %v568_v61 }
 0x48b   :  { %2596 = vtanh.f32 %v578_v0  ;;  %v620_v22 = vrot.slane %v578_v0, 4 }
 0x490   :  { %v2595_v1 = vpop.eup %2594 }
 0x491   :  { %552 = vrot.lane.b32.xlu1 %v2595_v1, %s2727_s4 }
 0x495   :  { %589 = vperm.xlu1 %2565, %v587_v2  }
 0x498   :  { %v2597_v63 = vpop.eup %2596 }
 0x499   :  { %581 = vrot.lane.b32.xlu0 %v2597_v63, %s2727_s4 }
 0x49d   :  { %610 = vperm.xlu0 %2564, %v608_v3  }
 0x503   :  { %v553_v5 = vpop.permute.xlu1 %552 }
 0x504   :  { %v555_v9 = vmul.f32 %v2591_v49, %v553_v5 }
 0x506   :  { %v593_v10 = vrot.slane %v555_v9, 2 }
 0x508   :  { %594 = vrot.lane.b32.xlu1 %v593_v10, %s2728_s0 }
 0x50b   :  { %v582_v15 = vpop.permute.xlu0 %581 }
 0x50c   :  { %v584_v20 = vmul.f32 %v2593_v52, %v582_v15  ;;  %601 = vrot.lane.b32.xlu1 %v600_v12, %s2729_s16  ;;  %v841_v12 = vsel %vm839_vm10, 1, %v2726_v19 }
 0x50e   :  { %v614_v21 = vrot.slane %v584_v20, 4  ;;  %v858_v20 = vsel %vm840_vm11, 1, %v2726_v19 }
 0x510   :  { %615 = vrot.lane.b32.xlu0 %v614_v21, %s2728_s0  ;;  %v2977_v25 = vpop.permute.xlu1 %589 }
 0x511   :  { %vm591_vm8 = vcmp.eq.s32.totalorder %v2977_v25, 1 }
 0x514   :  { %604 = vrot.lane.b32.xlu0 %v353_v55, %s2729_s16 }
 0x518   :  { %621 = vrot.lane.b32.xlu0 %v620_v22, %s2729_s16  ;;  %v2990_v29 = vpop.permute.xlu0 %610 }
 0x519   :  { %vm612_vm9 = vcmp.eq.s32.totalorder %v2990_v29, 1 }
 0x57a   :  { %v595_v27 = vpop.permute.xlu1 %594 }
 0x57b   :  { %v2983_v28 = vsel %vm591_vm8, %v595_v27, %v2920_v23 }
 0x57c   :  { %2412 = vmatmul.mubr.msk.f32.vlgmr.msra.gmra.mxu1 %vm49_vm1, %v2983_v28 }
 0x57d   :  { %2426 = vmatpush3.msra.mxu1 %v2794_v7  ;;  %2433 = vmatprep.mubr.msk.f32.mxu1 %vm2725_vm0, %v2724_v4 }
 0x57e   :  { %2427 = vmatprep.subr.mxu1 %v2724_v4  ;;  %v602_v31 = vpop.permute.xlu1 %601 }
 0x57f   :  { %2428 = vmatpush3.msra.mxu1 %v2799_v8 }
 0x580   :  { %2429 = vmatprep.subr.mxu1 %v2724_v4 }
 0x581   :  { %2430 = vmatpush3.msra.mxu1 %v2814_v11 }
 0x582   :  { %v616_v23 = vpop.permute.xlu0 %615  ;;  %2431 = vmatprep.subr.mxu1 %v2724_v4 }
 0x583   :  { %v3001_v30 = vsel %vm612_vm9, %v616_v23, %v2937_v26  ;;  %2432 = vmatpush3.msra.mxu1 %v2830_v14 }
 0x584   :  { %2423 = vmatmul.mubr.msk.f32.vlgmr.msra.gmra.mxu0 %vm49_vm1, %v3001_v30  ;;  %2447 = vmatprep.subr.mxu1 %v2724_v4 }
 0x585   :  { %2437 = vmatpush3.msra.mxu0 %v2825_v13  ;;  %2444 = vmatprep.mubr.msk.f32.mxu0 %vm2725_vm0, %v2724_v4 }
 0x586   :  { %v605_v32 = vpop.permute.xlu0 %604  ;;  %2438 = vmatprep.subr.mxu0 %v2724_v4 }
 0x587   :  { %v3013_v26 = vsel %vm591_vm8, %v602_v31, %v605_v32  ;;  %2439 = vmatpush3.msra.mxu0 %v2844_v16 }
 0x588   :  { %v789_v33 = vrot.slane %v3013_v26, 4  ;;  %2440 = vmatprep.subr.mxu0 %v2724_v4 }
 0x589   :  { %2441 = vmatpush3.msra.mxu0 %v2852_v17 }
 0x58a   :  { %v622_v34 = vpop.permute.xlu0 %621  ;;  %790 = vrot.lane.b32.xlu0 %v789_v33, %s2728_s0  ;;  %2442 = vmatprep.subr.mxu0 %v2724_v4 }
 0x58b   :  { %v3024_v35 = vsel %vm612_vm9, %v622_v34, %v2956_v40  ;;  %2443 = vmatpush3.msra.mxu0 %v2862_v18 }
 0x58c   :  { %v818_v36 = vrot.slane %v3024_v35, 6  ;;  %2458 = vmatprep.subr.mxu0 %v2724_v4 }
 0x58e   :  { %819 = vrot.lane.b32.xlu0 %v818_v36, %s2728_s0 }
 0x5fc   :  { %v791_v62 = vpop.permute.xlu0 %790 }
 0x600   :  { %v820_v63 = vpop.permute.xlu0 %819 }
 0x63c   :  { %v696_v37 = vpop.f32.mrf.mxu1 }
 0x63d   :  { %v701_v38 = vrot.slane %v696_v37, 4 }
 0x63e   :  { %v2413_v41 = vpop.f32.mrf.mxu1 }
 0x63f   :  { %v703_v42 = vadd.f32 %v701_v38, %v625_v39 }
 0x641   :  { %2598 = vtanh.f32 %v703_v42  ;;  %v2240_v50 = vmul.f32 -1.442695, %v703_v42 }
 0x644   :  { %v773_v43 = vpop.f32.mrf.mxu0 }
 0x645   :  { %v778_v44 = vrot.slane %v773_v43, 6 }
 0x646   :  { %v2424_v47 = vpop.f32.mrf.mxu0 }
 0x647   :  { %v780_v40 = vadd.f32 %v778_v44, %v626_v46 }
 0x649   :  { %2600 = vtanh.f32 %v780_v40  ;;  %v2241_v51 = vmul.f32 -1.442695, %v780_v40  ;;  %v875_v40 = vld [vmem:[#allocation2 + $0x10] sm:$0xc0] }
 0x64a   :  { %2602 = vpow2.f32 %v2240_v50  ;;  %v876_v50 = vld [vmem:[#allocation2 + $0x8] sm:$0x3] }
 0x64b   :  { %2604 = vpow2.f32 %v2241_v51 }
 0x64e   :  { %v2599_v48 = vpop.eup %2598 }
 0x64f   :  { %795 = vrot.lane.b32.xlu1 %v2599_v48, %s2727_s4 }
 0x656   :  { %v2601_v49 = vpop.eup %2600 }
 0x657   :  { %824 = vrot.lane.b32.xlu1 %v2601_v49, %s2727_s4  ;;  %v2603_v52 = vpop.eup %2602 }
 0x658   :  { %v784_v53 = vadd.f32 1.0, %v2603_v52  ;;  %v2605_v54 = vpop.eup %2604 }
 0x659   :  { %v813_v55 = vadd.f32 1.0, %v2605_v54 }
 0x65a   :  { %2606 = vrcp.f32 %v784_v53 }
 0x65b   :  { %2608 = vrcp.f32 %v813_v55 }
 0x667   :  { %v2607_v56 = vpop.eup %2606 }
 0x668   :  { %v2609_v59 = vpop.eup %2608  ;;  %v793_v0 = vmul.f32 %v2607_v56, %v791_v62 }
 0x669   :  { %v822_v3 = vmul.f32 %v2609_v59, %v820_v63 }
 0x6c1   :  { %v796_v57 = vpop.permute.xlu1 %795 }
 0x6c2   :  { %v798_v58 = vmul.f32 %v2607_v56, %v796_v57 }
 0x6c4   :  { %800 = vrot.lane.b32.xlu1 %v798_v58, %s2728_s0 }
 0x6c9   :  { %v825_v60 = vpop.permute.xlu1 %824 }
 0x6ca   :  { %v827_v61 = vmul.f32 %v2609_v59, %v825_v60 }
 0x6cc   :  { %829 = vrot.lane.b32.xlu1 %v827_v61, %s2728_s0 }
 0x736   :  { %v801_v1 = vpop.permute.xlu1 %800 }
 0x737   :  { %v803_v2 = vadd.f32 %v801_v1, %v793_v0 }
 0x739   :  { %2610 = vtanh.f32 %v803_v2  ;;  %v853_v23 = vrot.slane %v803_v2, 4 }
 0x73e   :  { %v830_v5 = vpop.permute.xlu1 %829 }
 0x73f   :  { %v832_v9 = vadd.f32 %v830_v5, %v822_v3 }
 0x741   :  { %2612 = vtanh.f32 %v832_v9  ;;  %v870_v33 = vrot.slane %v832_v9, 2 }
 0x746   :  { %v2611_v10 = vpop.eup %2610 }
 0x747   :  { %806 = vrot.lane.b32.xlu0 %v2611_v10, %s2727_s4 }
 0x74b   :  { %843 = vperm.xlu0 %2564, %v841_v12  }
 0x74e   :  { %v2613_v15 = vpop.eup %2612 }
 0x74f   :  { %835 = vrot.lane.b32.xlu1 %v2613_v15, %s2727_s4 }
 0x753   :  { %860 = vperm.xlu1 %2565, %v858_v20  }
 0x7b9   :  { %v807_v21 = vpop.permute.xlu0 %806 }
 0x7ba   :  { %v809_v22 = vmul.f32 %v2607_v56, %v807_v21 }
 0x7bc   :  { %v847_v27 = vrot.slane %v809_v22, 4 }
 0x7be   :  { %848 = vrot.lane.b32.xlu0 %v847_v27, %s2728_s0 }
 0x7c1   :  { %v836_v31 = vpop.permute.xlu1 %835 }
 0x7c2   :  { %v838_v32 = vmul.f32 %v2609_v59, %v836_v31  ;;  %854 = vrot.lane.b32.xlu0 %v853_v23, %s2729_s16  ;;  %v1087_v31 = vsel %vm1085_vm15, 1, %v2726_v19 }
 0x7c4   :  { %v864_v34 = vrot.slane %v838_v32, 2 }
 0x7c6   :  { %865 = vrot.lane.b32.xlu1 %v864_v34, %s2728_s0  ;;  %871 = vrot.lane.b32.xlu0 %v870_v33, %s2729_s16  ;;  %v3044_v36 = vpop.permute.xlu0 %843 }
 0x7c7   :  { %vm845_vm12 = vcmp.eq.s32.totalorder %v3044_v36, 1 }
 0x7ce   :  { %v3057_v39 = vpop.permute.xlu1 %860 }
 0x7cf   :  { %vm862_vm13 = vcmp.eq.s32.totalorder %v3057_v39, 1 }
 0x830   :  { %v849_v37 = vpop.permute.xlu0 %848 }
 0x831   :  { %v3050_v38 = vsel %vm845_vm12, %v849_v37, %v2983_v28 }
 0x832   :  { %2434 = vmatmul.mubr.msk.f32.vlgmr.msra.gmra.mxu1 %vm49_vm1, %v3050_v38 }
 0x833   :  { %2448 = vmatpush3.msra.mxu1 %v2794_v7  ;;  %2455 = vmatprep.mubr.msk.f32.mxu1 %vm2725_vm0, %v2724_v4 }
 0x834   :  { %v855_v41 = vpop.permute.xlu0 %854  ;;  %2449 = vmatprep.subr.mxu1 %v2724_v4 }
 0x835   :  { %v3063_v42 = vsel %vm845_vm12, %v855_v41, %v3013_v26  ;;  %2450 = vmatpush3.msra.mxu1 %v2799_v8 }
 0x836   :  { %v1036_v28 = vrot.slane %v3063_v42, 2  ;;  %2451 = vmatprep.subr.mxu1 %v2724_v4 }
 0x837   :  { %2452 = vmatpush3.msra.mxu1 %v2814_v11 }
 0x838   :  { %v866_v43 = vpop.permute.xlu1 %865  ;;  %1037 = vrot.lane.b32.xlu0 %v1036_v28, %s2728_s0  ;;  %v872_v44 = vpop.permute.xlu0 %871  ;;  %2453 = vmatprep.subr.mxu1 %v2724_v4 }
 0x839   :  { %v868_v26 = vsel %vm862_vm13, %v866_v43, %v3001_v30  ;;  %2454 = vmatpush3.msra.mxu1 %v2830_v14  ;;  %v874_v46 = vsel %vm862_vm13, %v872_v44, %v3024_v35  ;;  %v1104_v30 = vsel %vm1086_vm14, 1, %v2726_v19 }
 0x83a   :  { %2445 = vmatmul.mubr.msk.f32.vlgmr.msra.gmra.mxu0 %vm49_vm1, %v868_v26  ;;  %2469 = vmatprep.subr.mxu1 %v2724_v4 }
 0x83b   :  { %2459 = vmatpush3.msra.mxu0 %v2825_v13  ;;  %2466 = vmatprep.mubr.msk.f32.mxu0 %vm2725_vm0, %v2724_v4 }
 0x83c   :  { %1065 = vrot.lane.b32.xlu0 %v874_v46, %s2728_s0  ;;  %2460 = vmatprep.subr.mxu0 %v2724_v4 }
 0x83d   :  { %2461 = vmatpush3.msra.mxu0 %v2844_v16 }
 0x83e   :  { %2462 = vmatprep.subr.mxu0 %v2724_v4 }
 0x83f   :  { %2463 = vmatpush3.msra.mxu0 %v2852_v17 }
 0x840   :  { %1106 = vperm.xlu0 %2564, %v1104_v30   ;;  %2464 = vmatprep.subr.mxu0 %v2724_v4 }
 0x841   :  { %2465 = vmatpush3.msra.mxu0 %v2862_v18 }
 0x842   :  { %2480 = vmatprep.subr.mxu0 %v2724_v4 }
 0x8aa   :  { %v1038_v5 = vpop.permute.xlu0 %1037 }
 0x8ae   :  { %v3098_v15 = vpop.permute.xlu0 %1065 }
 0x8bb   :  { %v3109_v34 = vpop.permute.xlu0 %1106 }
 0x8bc   :  { %vm1108_vm2 = vcmp.eq.s32.totalorder %v3109_v34, 1 }
 0x8f2   :  { %v946_v35 = vpop.f32.mrf.mxu1 }
 0x8f3   :  { %v951_v47 = vrot.slane %v946_v35, 2 }
 0x8f4   :  { %v2435_v48 = vpop.f32.mrf.mxu1 }
 0x8f5   :  { %v953_v49 = vadd.f32 %v951_v47, %v875_v40 }
 0x8f7   :  { %2614 = vtanh.f32 %v953_v49  ;;  %v2244_v56 = vmul.f32 -1.442695, %v953_v49 }
 0x8fa   :  { %v1023_v51 = vpop.f32.mrf.mxu0 }
 0x8fb   :  { %v1027_v52 = vadd.f32 %v1023_v51, %v876_v50 }
 0x8fc   :  { %v2446_v53 = vpop.f32.mrf.mxu0 }
 0x8fd   :  { %2616 = vtanh.f32 %v1027_v52  ;;  %v2245_v57 = vmul.f32 -1.442695, %v1027_v52 }
 0x8fe   :  { %2618 = vpow2.f32 %v2244_v56 }
 0x8ff   :  { %2620 = vpow2.f32 %v2245_v57 }
 0x904   :  { %v2615_v54 = vpop.eup %2614 }
 0x905   :  { %1042 = vrot.lane.b32.xlu1 %v2615_v54, %s2727_s4 }
 0x90a   :  { %v2617_v55 = vpop.eup %2616 }
 0x90b   :  { %1070 = vrot.lane.b32.xlu1 %v2617_v55, %s2727_s4  ;;  %v2619_v58 = vpop.eup %2618 }
 0x90c   :  { %v1031_v59 = vadd.f32 1.0, %v2619_v58  ;;  %v2621_v60 = vpop.eup %2620 }
 0x90d   :  { %v1060_v61 = vadd.f32 1.0, %v2621_v60 }
 0x90e   :  { %2622 = vrcp.f32 %v1031_v59 }
 0x90f   :  { %2624 = vrcp.f32 %v1060_v61 }
 0x91b   :  { %v2623_v62 = vpop.eup %2622 }
 0x91c   :  { %v2625_v2 = vpop.eup %2624  ;;  %v1040_v9 = vmul.f32 %v2623_v62, %v1038_v5 }
 0x91d   :  { %v1068_v20 = vmul.f32 %v2625_v2, %v3098_v15 }
 0x977   :  { %v1043_v0 = vpop.permute.xlu1 %1042 }
 0x978   :  { %v1045_v1 = vmul.f32 %v2623_v62, %v1043_v0 }
 0x97a   :  { %1047 = vrot.lane.b32.xlu1 %v1045_v1, %s2728_s0 }
 0x97d   :  { %v1071_v63 = vpop.permute.xlu1 %1070 }
 0x97e   :  { %v1073_v3 = vmul.f32 %v2625_v2, %v1071_v63 }
 0x980   :  { %1075 = vrot.lane.b32.xlu1 %v1073_v3, %s2728_s0 }
 0x9ec   :  { %v1048_v10 = vpop.permute.xlu1 %1047 }
 0x9ed   :  { %v1050_v12 = vadd.f32 %v1048_v10, %v1040_v9 }
 0x9ef   :  { %2626 = vtanh.f32 %v1050_v12  ;;  %v1099_v28 = vrot.slane %v1050_v12, 6 }
 0x9f2   :  { %v1076_v21 = vpop.permute.xlu1 %1075 }
 0x9f3   :  { %v3101_v22 = vadd.f32 %v1076_v21, %v1068_v20 }
 0x9f5   :  { %2628 = vtanh.f32 %v3101_v22 }
 0x9fc   :  { %v2627_v27 = vpop.eup %2626 }
 0x9fd   :  { %1053 = vrot.lane.b32.xlu1 %v2627_v27, %s2727_s4 }
 0xa01   :  { %1109 = vrot.lane.b32.xlu1 %v868_v26, %s2729_s16 }
 0xa02   :  { %v2629_v23 = vpop.eup %2628 }
 0xa03   :  { %1081 = vrot.lane.b32.xlu0 %v2629_v23, %s2727_s4 }
 0xa07   :  { %1089 = vperm.xlu0 %2564, %v1087_v31  }
 0xa6f   :  { %v1054_v32 = vpop.permute.xlu1 %1053 }
 0xa70   :  { %v1056_v33 = vmul.f32 %v2623_v62, %v1054_v32  ;;  %v3166_v62 = vsel %vm1108_vm2, %v3101_v22, %v3098_v15 }
 0xa72   :  { %v1093_v37 = vrot.slane %v1056_v33, 6  ;;  %v3188_v33 = vld [vmem:[%s3414_s3 + $0x18] sm:$0xff] }
 0xa73   :  { %v1110_v44 = vpop.permute.xlu1 %1109 }
 0xa74   :  { %1094 = vrot.lane.b32.xlu1 %v1093_v37, %s2728_s0  ;;  %v3197_v37 = vld [vmem:[%s3414_s3 + $0x10] sm:$0xff] }
 0xa75   :  { %v1082_v41 = vpop.permute.xlu0 %1081 }
 0xa76   :  { %v1084_v43 = vmul.f32 %v2625_v2, %v1082_v41  ;;  %v1305_v2 = vrot.slane %v3166_v62, 2 }
 0xa78   :  { %1100 = vrot.lane.b32.xlu1 %v1099_v28, %s2729_s16  ;;  %v1112_v45 = vsel %vm1108_vm2, %v1084_v43, %v1110_v44  ;;  %v3209_v43 = vld [vmem:[%s3414_s3 + $0x8] sm:$0xff]  ;;  %v3218_v44 = vld [vmem:[%s3414_s3] sm:$0xff] }
 0xa79   :  { %1191 = vrot.lane.b32.xlu0 %v1112_v45, %s2728_s0  ;;  %v3224_v45 = vld [vmem:[%s3414_s3 + $0x38] sm:$0xff] }
 0xa82   :  { %v3117_v19 = vpop.permute.xlu0 %1089 }
 0xa83   :  { %vm1091_vm3 = vcmp.eq.s32.totalorder %v3117_v19, 1 }
 0xae6   :  { %v1095_v26 = vpop.permute.xlu1 %1094 }
 0xae7   :  { %v3123_v46 = vsel %vm1091_vm3, %v1095_v26, %v3050_v38  ;;  %v1115_v38 = vld [vmem:[#allocation2] sm:$0xc0]  ;;  %v3233_v26 = vld [vmem:[%s3414_s3 + $0x30] sm:$0xff] }
 0xae8   :  { %2456 = vmatmul.mubr.msk.f32.vlgmr.msra.gmra.mxu1 %vm49_vm1, %v3123_v46 }
 0xae9   :  { %2470 = vmatpush3.msra.mxu1 %v2794_v7  ;;  %2477 = vmatprep.mubr.msk.f32.mxu1 %vm2725_vm0, %v2724_v4  ;;  %v1114_v7 = vld [vmem:[#allocation2 + $0x18] sm:$0x3] }
 0xaea   :  { %2471 = vmatprep.subr.mxu1 %v2724_v4  ;;  %v1101_v40 = vpop.permute.xlu1 %1100 }
 0xaeb   :  { %v3131_v30 = vpop.permute.xlu0 %1191  ;;  %2472 = vmatpush3.msra.mxu1 %v2799_v8 }
 0xaec   :  { %2467 = vmatmul.mubr.msk.f32.vlgmr.msra.gmra.mxu0 %vm49_vm1, %v3131_v30  ;;  %2473 = vmatprep.subr.mxu1 %v2724_v4 }
 0xaed   :  { %2474 = vmatpush3.msra.mxu1 %v2814_v11  ;;  %2481 = vmatpush3.msra.mxu0 %v2825_v13 }
 0xaee   :  { %2475 = vmatprep.subr.mxu1 %v2724_v4  ;;  %2482 = vmatprep.subr.mxu0 %v2724_v4 }
 0xaef   :  { %2476 = vmatpush3.msra.mxu1 %v2830_v14  ;;  %2483 = vmatpush3.msra.mxu0 %v2844_v16 }
 0xaf0   :  { %2484 = vmatprep.subr.mxu0 %v2724_v4  ;;  %2488 = vmatprep.mubr.msk.f32.mxu0 %vm2725_vm0, %v2724_v4 }
 0xaf1   :  { %2485 = vmatpush3.msra.mxu0 %v2852_v17  ;;  %2491 = vmatprep.subr.mxu1 %v2724_v4 }
 0xaf2   :  { %2486 = vmatprep.subr.mxu0 %v2724_v4 }
 0xaf3   :  { %2487 = vmatpush3.msra.mxu0 %v2862_v18  ;;  %v1103_v18 = vsel %vm1091_vm3, %v1101_v40, %v3063_v42 }
 0xaf4   :  { %2502 = vmatprep.subr.mxu0 %v2724_v4 }
 0xba8   :  { %v1185_v8 = vpop.f32.mrf.mxu1 }
 0xba9   :  { %v1189_v11 = vadd.f32 %v1185_v8, %v1114_v7 }
 0xbaa   :  { %v2457_v13 = vpop.f32.mrf.mxu1 }
 0xbab   :  { %2630 = vtanh.f32 %v1189_v11  ;;  %v2248_v49 = vmul.f32 -1.442695, %v1189_v11  ;;  %v1345_v11 = vld [vmem:[#allocation2 + $0x18] sm:$0xc] }
 0xbac   :  { %v1261_v14 = vpop.f32.mrf.mxu0 }
 0xbad   :  { %v1266_v16 = vrot.slane %v1261_v14, 2 }
 0xbae   :  { %v2468_v35 = vpop.f32.mrf.mxu0 }
 0xbaf   :  { %v1268_v47 = vadd.f32 %v1266_v16, %v1115_v38  ;;  %v1346_v35 = vld [vmem:[#allocation2] sm:$0x30] }
 0xbb1   :  { %2632 = vtanh.f32 %v1268_v47  ;;  %v2249_v50 = vmul.f32 -1.442695, %v1268_v47 }
 0xbb2   :  { %2634 = vpow2.f32 %v2248_v49 }
 0xbb3   :  { %2636 = vpow2.f32 %v2249_v50 }
 0xbb8   :  { %v2631_v17 = vpop.eup %2630 }
 0xbb9   :  { %1282 = vrot.lane.b32.xlu0 %v2631_v17, %s2727_s4 }
 0xbbd   :  { %1277 = vrot.lane.b32.xlu0 %v1103_v18, %s2728_s0 }
 0xbbe   :  { %v2633_v48 = vpop.eup %2632 }
 0xbbf   :  { %1309 = vrot.lane.b32.xlu1 %v2633_v48, %s2727_s4  ;;  %v2635_v51 = vpop.eup %2634 }
 0xbc0   :  { %v1272_v52 = vadd.f32 1.0, %v2635_v51  ;;  %v2637_v53 = vpop.eup %2636 }
 0xbc1   :  { %v1300_v54 = vadd.f32 1.0, %v2637_v53 }
 0xbc2   :  { %2638 = vrcp.f32 %v1272_v52 }
 0xbc3   :  { %2640 = vrcp.f32 %v1300_v54 }
 0xbcf   :  { %v2639_v55 = vpop.eup %2638 }
 0xbd0   :  { %v2641_v42 = vpop.eup %2640 }
 0xbd1   :  { %v1307_v63 = vmul.f32 %v2641_v42, %v1305_v2 }
 0xc2b   :  { %v1283_v56 = vpop.permute.xlu0 %1282 }
 0xc2c   :  { %v1285_v57 = vmul.f32 %v2639_v55, %v1283_v56 }
 0xc2e   :  { %1287 = vrot.lane.b32.xlu1 %v1285_v57, %s2728_s0 }
 0xc2f   :  { %v3159_v60 = vpop.permute.xlu0 %1277 }
 0xc30   :  { %v1280_v61 = vmul.f32 %v2639_v55, %v3159_v60 }
 0xc31   :  { %v1310_v58 = vpop.permute.xlu1 %1309 }
 0xc32   :  { %v1312_v59 = vmul.f32 %v2641_v42, %v1310_v58 }
 0xc34   :  { %1314 = vrot.lane.b32.xlu0 %v1312_v59, %s2728_s0 }
 0xca0   :  { %v1288_v0 = vpop.permute.xlu1 %1287 }
 0xca1   :  { %v3168_v1 = vadd.f32 %v1288_v0, %v1280_v61 }
 0xca3   :  { %2642 = vtanh.f32 %v3168_v1  ;;  %v1328_v2 = vsel %vm1108_vm2, %v3168_v1, %v3159_v60 }
 0xca6   :  { %v1315_v3 = vpop.permute.xlu0 %1314 }
 0xca7   :  { %v1317_v5 = vadd.f32 %v1315_v3, %v1307_v63  ;;  %v1511_v63 = vrot.slane %v1328_v2, 6 }
 0xca9   :  { %2644 = vtanh.f32 %v1317_v5  ;;  %v1337_v31 = vrot.slane %v1317_v5, 6 }
 0xcb0   :  { %v2643_v9 = vpop.eup %2642 }
 0xcb1   :  { %1293 = vrot.lane.b32.xlu1 %v2643_v9, %s2727_s4 }
 0xcb5   :  { %1324 = vrot.lane.b32.xlu1 %v3123_v46, %s2729_s16  ;;  %v3241_v46 = vld [vmem:[%s3414_s3 + $0x28] sm:$0xff] }
 0xcb6   :  { %v2645_v10 = vpop.eup %2644 }
 0xcb7   :  { %1320 = vrot.lane.b32.xlu0 %v2645_v10, %s2727_s4 }
 0xd23   :  { %v1294_v12 = vpop.permute.xlu1 %1293 }
 0xd24   :  { %v1296_v15 = vmul.f32 %v2639_v55, %v1294_v12 }
 0xd27   :  { %v1325_v20 = vpop.permute.xlu1 %1324 }
 0xd28   :  { %v1327_v21 = vsel %vm1108_vm2, %v1296_v15, %v1325_v20 }
 0xd29   :  { %v1321_v22 = vpop.permute.xlu0 %1320  ;;  %1348 = vrot.lane.b32.xlu0 %v1327_v21, %s2728_s0 }
 0xd2a   :  { %v1323_v27 = vmul.f32 %v2641_v42, %v1321_v22 }
 0xd2c   :  { %v1330_v23 = vrot.slane %v1323_v27, 6 }
 0xd2e   :  { %1331 = vrot.lane.b32.xlu1 %v1330_v23, %s2728_s0 }
 0xd32   :  { %1338 = vrot.lane.b32.xlu1 %v1337_v31, %s2729_s16 }
 0xd9b   :  { %v3181_v32 = vpop.permute.xlu0 %1348 }
 0xd9c   :  { %2478 = vmatmul.mubr.msk.f32.vlgmr.msra.gmra.mxu1 %vm49_vm1, %v3181_v32 }
 0xd9d   :  { %2492 = vmatpush3.msra.mxu1 %v3188_v33  ;;  %2499 = vmatprep.mubr.msk.f32.mxu1 %vm2725_vm0, %v2724_v4 }
 0xd9e   :  { %2493 = vmatprep.subr.mxu1 %v2724_v4 }
 0xd9f   :  { %2494 = vmatpush3.msra.mxu1 %v3197_v37 }
 0xda0   :  { %v1332_v41 = vpop.permute.xlu1 %1331  ;;  %2495 = vmatprep.subr.mxu1 %v2724_v4 }
 0xda1   :  { %v3204_v28 = vsel %vm1091_vm3, %v1332_v41, %v3131_v30  ;;  %2496 = vmatpush3.msra.mxu1 %v3209_v43  ;;  %v3248_v30 = vld [vmem:[%s3414_s3 + $0x20] sm:$0xff] }
 0xda2   :  { %2489 = vmatmul.mubr.msk.f32.vlgmr.msra.gmra.mxu0 %vm49_vm1, %v3204_v28  ;;  %2497 = vmatprep.subr.mxu1 %v2724_v4 }
 0xda3   :  { %2498 = vmatpush3.msra.mxu1 %v3218_v44  ;;  %2503 = vmatpush3.msra.mxu0 %v3224_v45 }
 0xda4   :  { %2504 = vmatprep.subr.mxu0 %v2724_v4  ;;  %2510 = vmatprep.mubr.msk.f32.mxu0 %vm2725_vm0, %v2724_v4  ;;  %v1339_v57 = vpop.permute.xlu1 %1338 }
 0xda5   :  { %2505 = vmatpush3.msra.mxu0 %v3233_v26  ;;  %2513 = vmatprep.subr.mxu1 %v2724_v4 }
 0xda6   :  { %2506 = vmatprep.subr.mxu0 %v2724_v4 }
 0xda7   :  { %2507 = vmatpush3.msra.mxu0 %v3241_v46 }
 0xda8   :  { %2508 = vmatprep.subr.mxu0 %v2724_v4 }
 0xda9   :  { %2509 = vmatpush3.msra.mxu0 %v3248_v30 }
 0xdaa   :  { %2524 = vmatprep.subr.mxu0 %v2724_v4 }
 0xe5c   :  { %v1418_v7 = vpop.f32.mrf.mxu1 }
 0xe5d   :  { %v1423_v8 = vrot.slane %v1418_v7, 6 }
 0xe5e   :  { %v2479_v13 = vpop.f32.mrf.mxu1 }
 0xe5f   :  { %v1425_v14 = vadd.f32 %v1423_v8, %v1345_v11  ;;  %v1587_v13 = vld [vmem:[#allocation2 + $0x18] sm:$0x30] }
 0xe61   :  { %2646 = vtanh.f32 %v1425_v14  ;;  %v2252_v48 = vmul.f32 -1.442695, %v1425_v14 }
 0xe62   :  { %v1495_v16 = vpop.f32.mrf.mxu0 }
 0xe63   :  { %v1500_v38 = vrot.slane %v1495_v16, 4 }
 0xe64   :  { %v2490_v47 = vpop.f32.mrf.mxu0 }
 0xe65   :  { %v1502_v17 = vadd.f32 %v1500_v38, %v1346_v35  ;;  %v1588_v47 = vld [vmem:[#allocation2] sm:$0xc] }
 0xe67   :  { %2648 = vtanh.f32 %v1502_v17  ;;  %v2253_v49 = vmul.f32 -1.442695, %v1502_v17 }
 0xe68   :  { %2650 = vpow2.f32 %v2252_v48 }
 0xe69   :  { %2652 = vpow2.f32 %v2253_v49 }
 0xe6e   :  { %v2647_v40 = vpop.eup %2646 }
 0xe6f   :  { %1515 = vrot.lane.b32.xlu0 %v2647_v40, %s2727_s4 }
 0xe73   :  { %1341 = vrot.lane.b32.xlu0 %v3166_v62, %s2729_s16 }
 0xe74   :  { %v2649_v18 = vpop.eup %2648 }
 0xe75   :  { %1544 = vrot.lane.b32.xlu1 %v2649_v18, %s2727_s4  ;;  %v2651_v50 = vpop.eup %2650 }
 0xe76   :  { %v1506_v51 = vadd.f32 1.0, %v2651_v50  ;;  %v2653_v52 = vpop.eup %2652 }
 0xe77   :  { %v1533_v53 = vadd.f32 1.0, %v2653_v52 }
 0xe78   :  { %2654 = vrcp.f32 %v1506_v51 }
 0xe79   :  { %2656 = vrcp.f32 %v1533_v53 }
 0xe85   :  { %v2655_v54 = vpop.eup %2654 }
 0xe86   :  { %v2657_v59 = vpop.eup %2656  ;;  %v1513_v3 = vmul.f32 %v2655_v54, %v1511_v63 }
 0xee1   :  { %v1516_v55 = vpop.permute.xlu0 %1515 }
 0xee2   :  { %v1518_v56 = vmul.f32 %v2655_v54, %v1516_v55 }
 0xee4   :  { %1520 = vrot.lane.b32.xlu0 %v1518_v56, %s2728_s0 }
 0xee5   :  { %v1342_v42 = vpop.permute.xlu0 %1341 }
 0xee6   :  { %v3259_v58 = vsel %vm1091_vm3, %v1339_v57, %v1342_v42 }
 0xee7   :  { %v1538_v61 = vrot.slane %v3259_v58, 4  ;;  %v1545_v62 = vpop.permute.xlu1 %1544 }
 0xee8   :  { %v1547_v0 = vmul.f32 %v2657_v59, %v1545_v62 }
 0xee9   :  { %1539 = vrot.lane.b32.xlu1 %v1538_v61, %s2728_s0 }
 0xeea   :  { %1549 = vrot.lane.b32.xlu0 %v1547_v0, %s2728_s0 }
 0xf56   :  { %v1521_v5 = vpop.permute.xlu0 %1520 }
 0xf57   :  { %v1523_v19 = vadd.f32 %v1521_v5, %v1513_v3 }
 0xf59   :  { %2658 = vtanh.f32 %v1523_v19  ;;  %v1567_v60 = vrot.slane %v1523_v19, 2 }
 0xf5b   :  { %v1540_v9 = vpop.permute.xlu1 %1539 }
 0xf5c   :  { %v1542_v10 = vmul.f32 %v2657_v59, %v1540_v9  ;;  %v1550_v12 = vpop.permute.xlu0 %1549 }
 0xf5e   :  { %v1552_v15 = vadd.f32 %v1550_v12, %v1542_v10 }
 0xf60   :  { %2660 = vtanh.f32 %v1552_v15  ;;  %v1582_v41 = vrot.slane %v1552_v15, 4 }
 0xf66   :  { %v2659_v20 = vpop.eup %2658 }
 0xf67   :  { %1526 = vrot.lane.b32.xlu1 %v2659_v20, %s2727_s4 }
 0xf6d   :  { %v2661_v21 = vpop.eup %2660 }
 0xf6e   :  { %1555 = vrot.lane.b32.xlu0 %v2661_v21, %s2727_s4 }
 0xfd9   :  { %v1527_v22 = vpop.permute.xlu1 %1526 }
 0xfda   :  { %v1529_v27 = vmul.f32 %v2655_v54, %v1527_v22 }
 0xfdc   :  { %v1560_v34 = vrot.slane %v1529_v27, 2 }
 0xfde   :  { %1561 = vrot.lane.b32.xlu1 %v1560_v34, %s2728_s0 }
 0xfe0   :  { %v1556_v1 = vpop.permute.xlu0 %1555 }
 0xfe1   :  { %v1558_v23 = vmul.f32 %v2657_v59, %v1556_v1 }
 0xfe2   :  { %1568 = vrot.lane.b32.xlu1 %v1567_v60, %s2729_s16 }
 0xfe3   :  { %v1576_v31 = vrot.slane %v1558_v23, 4 }
 0xfe5   :  { %1577 = vrot.lane.b32.xlu0 %v1576_v31, %s2728_s0 }
 0xfe9   :  { %1571 = vrot.lane.b32.xlu0 %v1328_v2, %s2729_s16 }
 0xfed   :  { %1583 = vrot.lane.b32.xlu0 %v1582_v41, %s2729_s16 }
0x1050   :  { %v1562_v7 = vpop.permute.xlu1 %1561 }
0x1051   :  { %v3278_v8 = vsel %vm862_vm13, %v1562_v7, %v3181_v32 }
0x1052   :  { %2500 = vmatmul.mubr.msk.f32.vlgmr.msra.gmra.mxu1 %vm49_vm1, %v3278_v8 }
0x1053   :  { %2514 = vmatpush3.msra.mxu1 %v3188_v33  ;;  %2521 = vmatprep.mubr.msk.f32.mxu1 %vm2725_vm0, %v2724_v4 }
0x1054   :  { %2515 = vmatprep.subr.mxu1 %v2724_v4  ;;  %v1569_v33 = vpop.permute.xlu1 %1568 }
0x1055   :  { %2516 = vmatpush3.msra.mxu1 %v3197_v37 }
0x1056   :  { %2517 = vmatprep.subr.mxu1 %v2724_v4 }
0x1057   :  { %v1578_v11 = vpop.permute.xlu0 %1577  ;;  %2518 = vmatpush3.msra.mxu1 %v3209_v43 }
0x1058   :  { %v3292_v32 = vsel %vm845_vm12, %v1578_v11, %v3204_v28  ;;  %2519 = vmatprep.subr.mxu1 %v2724_v4 }
0x1059   :  { %2511 = vmatmul.mubr.msk.f32.vlgmr.msra.gmra.mxu0 %vm49_vm1, %v3292_v32  ;;  %2520 = vmatpush3.msra.mxu1 %v3218_v44 }
0x105a   :  { %2525 = vmatpush3.msra.mxu0 %v3224_v45  ;;  %2532 = vmatprep.mubr.msk.f32.mxu0 %vm2725_vm0, %v2724_v4 }
0x105b   :  { %v1572_v37 = vpop.permute.xlu0 %1571  ;;  %2526 = vmatprep.subr.mxu0 %v2724_v4  ;;  %2535 = vmatprep.subr.mxu1 %v2724_v4 }
0x105c   :  { %v3305_v28 = vsel %vm862_vm13, %v1569_v33, %v1572_v37  ;;  %2527 = vmatpush3.msra.mxu0 %v3233_v26  ;;  %v1825_v37 = vld [vmem:[#allocation2 + $0x18] sm:$0xc0] }
0x105d   :  { %v1751_v43 = vrot.slane %v3305_v28, 4  ;;  %2528 = vmatprep.subr.mxu0 %v2724_v4 }
0x105e   :  { %2529 = vmatpush3.msra.mxu0 %v3241_v46 }
0x105f   :  { %v1584_v44 = vpop.permute.xlu0 %1583  ;;  %1752 = vrot.lane.b32.xlu0 %v1751_v43, %s2728_s0  ;;  %2530 = vmatprep.subr.mxu0 %v2724_v4  ;;  %v1826_v43 = vld [vmem:[#allocation2] sm:$0x3] }
0x1060   :  { %v3316_v45 = vsel %vm845_vm12, %v1584_v44, %v3259_v58  ;;  %2531 = vmatpush3.msra.mxu0 %v3248_v30 }
0x1061   :  { %v1780_v39 = vrot.slane %v3316_v45, 6  ;;  %2546 = vmatprep.subr.mxu0 %v2724_v4 }
0x1063   :  { %1781 = vrot.lane.b32.xlu0 %v1780_v39, %s2728_s0 }
0x10d1   :  { %v1753_v58 = vpop.permute.xlu0 %1752 }
0x10d5   :  { %v1782_v0 = vpop.permute.xlu0 %1781 }
0x1112   :  { %v1658_v26 = vpop.f32.mrf.mxu1 }
0x1113   :  { %v1663_v46 = vrot.slane %v1658_v26, 4 }
0x1114   :  { %v2501_v14 = vpop.f32.mrf.mxu1 }
0x1115   :  { %v1665_v16 = vadd.f32 %v1663_v46, %v1587_v13 }
0x1117   :  { %2662 = vtanh.f32 %v1665_v16  ;;  %v2256_v18 = vmul.f32 -1.442695, %v1665_v16 }
0x1119   :  { %v1735_v38 = vpop.f32.mrf.mxu0 }
0x111a   :  { %v1740_v35 = vrot.slane %v1735_v38, 6 }
0x111b   :  { %v2512_v36 = vpop.f32.mrf.mxu0 }
0x111c   :  { %v1742_v17 = vadd.f32 %v1740_v35, %v1588_v47 }
0x111e   :  { %2664 = vtanh.f32 %v1742_v17  ;;  %v2257_v48 = vmul.f32 -1.442695, %v1742_v17 }
0x111f   :  { %2666 = vpow2.f32 %v2256_v18 }
0x1120   :  { %2668 = vpow2.f32 %v2257_v48 }
0x1124   :  { %v2663_v40 = vpop.eup %2662 }
0x1125   :  { %1757 = vrot.lane.b32.xlu1 %v2663_v40, %s2727_s4 }
0x112b   :  { %v2665_v30 = vpop.eup %2664 }
0x112c   :  { %1786 = vrot.lane.b32.xlu1 %v2665_v30, %s2727_s4  ;;  %v2667_v49 = vpop.eup %2666 }
0x112d   :  { %v1746_v50 = vadd.f32 1.0, %v2667_v49  ;;  %v2669_v51 = vpop.eup %2668 }
0x112e   :  { %v1775_v52 = vadd.f32 1.0, %v2669_v51 }
0x112f   :  { %2670 = vrcp.f32 %v1746_v50 }
0x1130   :  { %2672 = vrcp.f32 %v1775_v52 }
0x113c   :  { %v2671_v53 = vpop.eup %2670 }
0x113d   :  { %v2673_v56 = vpop.eup %2672  ;;  %v1755_v59 = vmul.f32 %v2671_v53, %v1753_v58  ;;  %v2264_v58 = vld [vmem:[%s3416_s5 + $0x30] sm:$0xff] }
0x113e   :  { %v1784_v2 = vmul.f32 %v2673_v56, %v1782_v0  ;;  %v2045_v0 = vld [vmem:[%s3416_s5] sm:$0xff] }
0x1197   :  { %v1758_v54 = vpop.permute.xlu1 %1757 }
0x1198   :  { %v1760_v55 = vmul.f32 %v2671_v53, %v1758_v54 }
0x119a   :  { %1762 = vrot.lane.b32.xlu1 %v1760_v55, %s2728_s0 }
0x119e   :  { %v1787_v57 = vpop.permute.xlu1 %1786 }
0x119f   :  { %v1789_v42 = vmul.f32 %v2673_v56, %v1787_v57  ;;  %v2047_v57 = vld [vmem:[%s3416_s5 + $0x10] sm:$0xff] }
0x11a1   :  { %1791 = vrot.lane.b32.xlu1 %v1789_v42, %s2728_s0  ;;  %v2265_v42 = vld [vmem:[%s3416_s5 + $0x38] sm:$0xff] }
0x120c   :  { %v1763_v61 = vpop.permute.xlu1 %1762 }
0x120d   :  { %v1765_v62 = vadd.f32 %v1763_v61, %v1755_v59  ;;  %v2046_v59 = vld [vmem:[%s3416_s5 + $0x8] sm:$0xff] }
0x120f   :  { %2674 = vtanh.f32 %v1765_v62  ;;  %v1808_v15 = vrot.slane %v1765_v62, 4 }
0x1213   :  { %v1792_v63 = vpop.permute.xlu1 %1791 }
0x1214   :  { %v1794_v3 = vadd.f32 %v1792_v63, %v1784_v2  ;;  %v2263_v2 = vld [vmem:[%s3416_s5 + $0x28] sm:$0xff]  ;;  %v2262_v63 = vld [vmem:[%s3416_s5 + $0x20] sm:$0xff] }
0x1216   :  { %2676 = vtanh.f32 %v1794_v3  ;;  %v1820_v27 = vrot.slane %v1794_v3, 2 }
0x121c   :  { %v2675_v5 = vpop.eup %2674 }
0x121d   :  { %1768 = vrot.lane.b32.xlu0 %v2675_v5, %s2727_s4 }
0x1223   :  { %v2677_v19 = vpop.eup %2676 }
0x1224   :  { %1797 = vrot.lane.b32.xlu1 %v2677_v19, %s2727_s4 }
0x128f   :  { %v1769_v9 = vpop.permute.xlu0 %1768 }
0x1290   :  { %v1771_v10 = vmul.f32 %v2671_v53, %v1769_v9 }
0x1292   :  { %v1802_v12 = vrot.slane %v1771_v10, 4 }
0x1294   :  { %1803 = vrot.lane.b32.xlu0 %v1802_v12, %s2728_s0 }
0x1296   :  { %v1798_v20 = vpop.permute.xlu1 %1797 }
0x1297   :  { %v1800_v21 = vmul.f32 %v2673_v56, %v1798_v20  ;;  %v2048_v56 = vld [vmem:[%s3416_s5 + $0x18] sm:$0xff] }
0x1298   :  { %1809 = vrot.lane.b32.xlu0 %v1808_v15, %s2729_s16 }
0x1299   :  { %v1814_v22 = vrot.slane %v1800_v21, 2 }
0x129b   :  { %1815 = vrot.lane.b32.xlu1 %v1814_v22, %s2728_s0 }
0x129c   :  { %1821 = vrot.lane.b32.xlu0 %v1820_v27, %s2729_s16 }
0x1306   :  { %v1804_v34 = vpop.permute.xlu0 %1803 }
0x1307   :  { %v3335_v60 = vsel %vm612_vm9, %v1804_v34, %v3278_v8 }
0x1308   :  { %2522 = vmatmul.mubr.msk.f32.vlgmr.msra.gmra.mxu1 %vm49_vm1, %v3335_v60 }
0x1309   :  { %2543 = vmatprep.mubr.msk.f32.mxu1 %vm2725_vm0, %v2724_v4  ;;  %2536 = vmatpush3.msra.mxu1 %v2265_v42 }
0x130a   :  { %v1810_v1 = vpop.permute.xlu0 %1809  ;;  %2537 = vmatprep.subr.mxu1 %v2724_v4 }
0x130b   :  { %v1812_v23 = vsel %vm612_vm9, %v1810_v1, %v3305_v28  ;;  %2538 = vmatpush3.msra.mxu1 %v2264_v58 }
0x130c   :  { %v1986_v31 = vrot.slane %v1812_v23, 2  ;;  %2539 = vmatprep.subr.mxu1 %v2724_v4 }
0x130d   :  { %v1816_v41 = vpop.permute.xlu1 %1815  ;;  %2540 = vmatpush3.msra.mxu1 %v2263_v2 }
0x130e   :  { %v3347_v7 = vsel %vm591_vm8, %v1816_v41, %v3292_v32  ;;  %1987 = vrot.lane.b32.xlu0 %v1986_v31, %s2728_s0  ;;  %v1822_v8 = vpop.permute.xlu0 %1821  ;;  %2541 = vmatprep.subr.mxu1 %v2724_v4 }
0x130f   :  { %2533 = vmatmul.mubr.msk.f32.vlgmr.msra.gmra.mxu0 %vm49_vm1, %v3347_v7  ;;  %v1824_v29 = vsel %vm591_vm8, %v1822_v8, %v3316_v45  ;;  %2542 = vmatpush3.msra.mxu1 %v2262_v63 }
0x1310   :  { %2554 = vmatprep.mubr.msk.f32.mxu0 %vm2725_vm0, %v2724_v4  ;;  %2547 = vmatpush3.msra.mxu0 %v2048_v56  ;;  %vm2210_vm0 = vcmask 25600  }
0x1311   :  { %2548 = vmatprep.subr.mxu0 %v2724_v4 }
0x1312   :  { %2015 = vrot.lane.b32.xlu0 %v1824_v29, %s2728_s0  ;;  %2549 = vmatpush3.msra.mxu0 %v2047_v57 }
0x1313   :  { %2550 = vmatprep.subr.mxu0 %v2724_v4 }
0x1314   :  { %2551 = vmatpush3.msra.mxu0 %v2046_v59 }
0x1315   :  { %2552 = vmatprep.subr.mxu0 %v2724_v4 }
0x1316   :  { %2553 = vmatpush3.msra.mxu0 %v2045_v0 }
0x1380   :  { %v1988_v48 = vpop.permute.xlu0 %1987 }
0x1384   :  { %v2016_v52 = vpop.permute.xlu0 %2015 }
0x13c8   :  { %v1896_v11 = vpop.f32.mrf.mxu1 }
0x13c9   :  { %v1901_v33 = vrot.slane %v1896_v11, 2 }
0x13ca   :  { %v2523_v32 = vpop.f32.mrf.mxu1 }
0x13cb   :  { %v1903_v28 = vadd.f32 %v1901_v33, %v1825_v37 }
0x13cd   :  { %2678 = vtanh.f32 %v1903_v28  ;;  %v2260_v25 = vmul.f32 -1.442695, %v1903_v28 }
0x13cf   :  { %v1973_v44 = vpop.f32.mrf.mxu0 }
0x13d0   :  { %v1977_v39 = vadd.f32 %v1973_v44, %v1826_v43 }
0x13d1   :  { %v2534_v26 = vpop.f32.mrf.mxu0 }
0x13d2   :  { %2680 = vtanh.f32 %v1977_v39  ;;  %v2261_v45 = vmul.f32 -1.442695, %v1977_v39 }
0x13d3   :  { %2682 = vpow2.f32 %v2260_v25 }
0x13d4   :  { %2684 = vpow2.f32 %v2261_v45 }
0x13da   :  { %v2679_v46 = vpop.eup %2678 }
0x13db   :  { %1992 = vrot.lane.b32.xlu1 %v2679_v46, %s2727_s4 }
0x13df   :  { %v2681_v13 = vpop.eup %2680 }
0x13e0   :  { %2020 = vrot.lane.b32.xlu1 %v2681_v13, %s2727_s4  ;;  %v2683_v14 = vpop.eup %2682 }
0x13e1   :  { %v1981_v16 = vadd.f32 1.0, %v2683_v14  ;;  %v2685_v38 = vpop.eup %2684 }
0x13e2   :  { %v2010_v35 = vadd.f32 1.0, %v2685_v38 }
0x13e3   :  { %2686 = vrcp.f32 %v1981_v16 }
0x13e4   :  { %2688 = vrcp.f32 %v2010_v35 }
0x13f0   :  { %v2687_v47 = vpop.eup %2686 }
0x13f1   :  { %v2689_v40 = vpop.eup %2688  ;;  %v1990_v49 = vmul.f32 %v2687_v47, %v1988_v48 }
0x13f2   :  { %v2018_v53 = vmul.f32 %v2689_v40, %v2016_v52 }
0x144d   :  { %v1993_v36 = vpop.permute.xlu1 %1992 }
0x144e   :  { %v1995_v17 = vmul.f32 %v2687_v47, %v1993_v36 }
0x1450   :  { %1997 = vrot.lane.b32.xlu1 %v1995_v17, %s2728_s0 }
0x1452   :  { %v2021_v30 = vpop.permute.xlu1 %2020 }
0x1453   :  { %v2023_v18 = vmul.f32 %v2689_v40, %v2021_v30 }
0x1455   :  { %2025 = vrot.lane.b32.xlu1 %v2023_v18, %s2728_s0 }
0x14c2   :  { %v1998_v50 = vpop.permute.xlu1 %1997 }
0x14c3   :  { %v2000_v51 = vadd.f32 %v1998_v50, %v1990_v49 }
0x14c5   :  { %2690 = vtanh.f32 %v2000_v51 }
0x14c7   :  { %v2026_v54 = vpop.permute.xlu1 %2025 }
0x14c8   :  { %v2028_v55 = vadd.f32 %v2026_v54, %v2018_v53 }
0x14ca   :  { %2692 = vtanh.f32 %v2028_v55 }
0x14d2   :  { %v2691_v61 = vpop.eup %2690 }
0x14d3   :  { %2003 = vrot.lane.b32.xlu0 %v2691_v61, %s2727_s4 }
0x14d7   :  { %v2693_v62 = vpop.eup %2692  ;;  %2041 = vrot.lane.b32.xlu0 %v3347_v7, %s2729_s16  ;;  %s2730_s16 = smov [#allocation3]  }
0x14d8   :  { %2031 = vrot.lane.b32.xlu1 %v2693_v62, %s2727_s4  ;;  %s2218_s24 = sshll.u32 %s2730_s16, 4  ;;  %s2219_s24 = int_to_ptr.vmem [resolvable:$true] %s2218_s24 }
0x14d9   :  { %p2707_p1 = scmp.lt.s32.totalorder %s2219_s24, %s2219_s24 }
0x1545   :  { %v2004_v3 = vpop.permute.xlu0 %2003 }
0x1546   :  { %v2006_v5 = vmul.f32 %v2687_v47, %v2004_v3 }
0x1548   :  { %v2036_v19 = vrot.slane %v2006_v5, 6 }
0x1549   :  { %v2042_v12 = vpop.permute.xlu0 %2041 }
0x154a   :  { %v2032_v9 = vpop.permute.xlu1 %2031  ;;  %2037 = vrot.lane.b32.xlu1 %v2036_v19, %s2728_s0 }
0x154b   :  { %v2034_v10 = vmul.f32 %v2689_v40, %v2032_v9 }
0x154d   :  { %v2044_v15 = vsel %vm351_vm4, %v2034_v10, %v2042_v12 }
0x154e   :  { %2055 = vrot.lane.b32.xlu0 %v2044_v15, %s2728_s0  ;;  %s2702_s0 = scalar_lea.vmem %s2219_s24, 32 }
0x154f   :  { %p2703_p0 = scmp.ne.s32.totalorder %s2219_s24, %s2702_s0  ;;  %p2708_p2 = scmp.lt.s32.totalorder %s2702_s0, %s2702_s0 }
0x1551   :  { %p2709_p3 = por %p2708_p2, %p2707_p1 }
0x1553   :  { %p2710_p4 = pnand %p2709_p3, %p2703_p0 }
0x15bc   :  { %v2038_v20 = vpop.permute.xlu1 %2037 }
0x15bd   :  { %v2040_v21 = vsel %vm358_vm5, %v2038_v20, %v3335_v60 }
0x15be   :  { %2555 = vmatmul.mubr.msk.f32.vlgmr.msra.gmra.mxu0 %vm49_vm1, %v2040_v21 }
0x15c0   :  { %v2056_v4 = vpop.permute.xlu0 %2055 }
0x15c1   :  { %2544 = vmatmul.mubr.msk.f32.vlgmr.msra.gmra.mxu1 %vm49_vm1, %v2056_v4 }
0x167e   :  { %v2198_v22 = vpop.f32.mrf.mxu0 }
0x1680   :  { %v2556_v27 = vpop.f32.mrf.mxu0 }
0x1681   :  { %v2125_v34 = vpop.f32.mrf.mxu1 }
0x1682   :  { %v2199_v1 = vadd.f32 %v2198_v22, %v2125_v34 }
0x1683   :  { %v2545_v23 = vpop.f32.mrf.mxu1 }
0x1684   :  { %v2209_v31 = vadd.f32 %v2268_v6, %v2199_v1 }
0x1686   :  { %2211 = vst.msk [vmem:[#allocation3] sm:$0x3] %vm2210_vm0, %v2209_v31 }
0x1687   :  { %2713 = shalt.err (!%p2710_p4)
}
0x1688   :  { %2221 = dma.vmem_to_hbm [thread:$0]  %s2219_s24, 32, %s3418_s7, [#allocation4]  }
0x1689   :  { %2722 = dma.done.wait [#allocation4], 32  }
0x168a   :  { %2723 = vsyncadd [#allocation4], 4294967264 }
0x168b   :  { %2225 = vsyncpa [#allocation4], 1 }

</bundles_post_ra>
